<compile_context>
chip_gen: v7x
topology: tpu7x:2x2x1
jax: 0.10.0
libtpu: 0.0.40
codegen_flags: <defaults>
</compile_context>

<pallas_src>
import functools

import jax
import jax.numpy as jnp
from jax import lax
from jax.experimental import pallas as pl
from jax.experimental.pallas import tpu as pltpu


# ----------------------------------------------------------------------------
# Fused kernel: one batch element per grid step.
#   x_ref:    [L, I]      input queries for this batch element
#   dep_ref:  [L, L]      syntactic dependency matrix
#   wih_ref:  [I, 8H]     packed input->gate weights (fwd+bwd, gate groups)
#   whh_ref:  [2H, 8H]    packed block-diagonal hidden->gate weights
#   bias_ref: [1, 8H]     packed (b_ih + b_hh) for both directions
#   wcat3_ref:[D, 3D]     [W1a^T | W1b^T | Wd^T]   (D = 2H)
#   w2_ref:   [1, D]      second w_wc linear (D -> 1)
#   wfc_ref:  [D, HID]    fc_query weight (transposed)
#   bfc_ref:  [1, HID]    fc_query bias
#   out_ref:  [L, HID]    lane-dense output slab
#   scratch:  xg [L, 8H], hf [L, H], hb [L, H]
# ----------------------------------------------------------------------------
def _encoder_kernel(x_ref, dep_ref, wih_ref, whh_ref, bias_ref, wcat3_ref,
                    w2_ref, wfc_ref, bfc_ref, out_ref, xg_ref, hf_ref, hb_ref,
                    *, seq_len, h_dir, num_gcn_layers, skip):
    L = seq_len
    H = h_dir            # per-direction hidden size (16)
    D = 2 * H            # bidirectional feature size (32)

    # ---------------- stage 1: bidirectional LSTM ----------------
    # Input projection for BOTH directions in one [L, I] x [I, 8H] matmul.
    # Gate-group column layout: [i_f i_b | f_f f_b | g_f g_b | o_f o_b].
    x = x_ref[...].astype(jnp.float32)                               # [L, I]
    xg_ref[...] = (jnp.dot(x, wih_ref[...],
                           preferred_element_type=jnp.float32)
                   + bias_ref[...])                                  # [L, 8H]

    whh = whh_ref[...]                                               # hoisted
    col = lax.broadcasted_iota(jnp.int32, (1, 8 * H), 1)
    fwd_mask = (col % (2 * H)) < H                                   # [1, 8H]

    h = jnp.zeros((1, D), jnp.float32)                               # [h_f | h_b]
    c = jnp.zeros((1, D), jnp.float32)
    for t in range(L):                                               # static unroll
        tr = L - 1 - t
        xt = xg_ref[pl.ds(t, 1), :]      # forward direction consumes x[t]
        xr = xg_ref[pl.ds(tr, 1), :]     # backward direction consumes x[L-1-t]
        gates = jnp.where(fwd_mask, xt, xr) + jnp.dot(
            h, whh, preferred_element_type=jnp.float32)              # [1, 8H]
        i_g = jax.nn.sigmoid(gates[:, 0 * D:1 * D])
        f_g = jax.nn.sigmoid(gates[:, 1 * D:2 * D])
        g_g = jnp.tanh(gates[:, 2 * D:3 * D])
        o_g = jax.nn.sigmoid(gates[:, 3 * D:4 * D])
        c = f_g * c + i_g * g_g
        h = o_g * jnp.tanh(c)
        hf_ref[pl.ds(t, 1), :] = h[:, 0:H]       # forward output at position t
        hb_ref[pl.ds(tr, 1), :] = h[:, H:D]      # backward output at position L-1-t

    # ---------------- stage 2: Syntac_GCN layers (shared weights) ----------------
    q = jnp.concatenate([hf_ref[...], hb_ref[...]], axis=-1)         # [L, D]
    dep = dep_ref[...].astype(jnp.float32)                           # [L, L]
    edge = dep != 0.0
    pos = jnp.logical_and(edge, dep > 0.0)
    wcat3 = wcat3_ref[...]                                           # hoisted
    w2 = w2_ref[...]                                                 # [1, D]
    for _ in range(num_gcn_layers):
        proj = jnp.dot(q, wcat3, preferred_element_type=jnp.float32)  # [L, 3D]
        a_i = proj[:, 0:D]            # W1a q_i
        b_j = proj[:, D:2 * D]        # W1b q_j
        h_j = proj[:, 2 * D:3 * D]    # Wd  q_j
        s = jnp.maximum(a_i[:, None, :] + b_j[None, :, :], 0.0)       # [L, L, D]
        t_raw = jnp.sum(s * w2[None, :, :], axis=-1)                  # [L, L]
        t_m = jnp.where(edge, t_raw, -100.0)
        t_m = t_m - jnp.max(t_m, axis=1, keepdims=True)
        e = jnp.exp(t_m)
        beta = e * pl.reciprocal(jnp.sum(e, axis=1, keepdims=True),
                                 approx=True)                         # softmax dim=1
        coeff = jnp.where(pos, beta, 0.0)
        h_sum = jnp.dot(coeff, h_j, preferred_element_type=jnp.float32)  # [L, D]
        q_new = jnp.maximum(q + h_sum, 0.0)
        if skip:
            q_new = q_new + q
        q = q_new

    # ---------------- stage 3: fc_query (Linear + ReLU) ----------------
    y = (jnp.dot(q, wfc_ref[...], preferred_element_type=jnp.float32)
         + bfc_ref[...])
    out_ref[...] = jnp.maximum(y, 0.0).astype(out_ref.dtype)


# ----------------------------------------------------------------------------
# Wrapper: one fused pallas_call; final transpose(1, 2) done once in XLA so the
# kernel's stores stay lane-dense.
# ----------------------------------------------------------------------------
def lstm_syntacgcn_encoder_forward(params, queries, wordlens, syntactic_dep,
                                   num_gcn_layers=2, skip=False):
    del wordlens  # pass-through in the reference module (no packing)
    B, L, I = queries.shape
    dep = syntactic_dep[:, :L, :L]
    h_dir = params["whh_blk"].shape[0] // 2
    hidden = params["wfc_t"].shape[1]

    kernel = functools.partial(_encoder_kernel, seq_len=L, h_dir=h_dir,
                               num_gcn_layers=num_gcn_layers, skip=skip)

    out = pl.pallas_call(
        kernel,
        out_shape=jax.ShapeDtypeStruct((B, L, hidden), jnp.float32),
        grid=(B,),
        in_specs=[
            pl.BlockSpec((None, L, I), lambda b: (b, 0, 0)),
            pl.BlockSpec((None, L, L), lambda b: (b, 0, 0)),
            pl.BlockSpec(params["wih_cat"].shape, lambda b: (0, 0)),
            pl.BlockSpec(params["whh_blk"].shape, lambda b: (0, 0)),
            pl.BlockSpec(params["b_cat"].shape, lambda b: (0, 0)),
            pl.BlockSpec(params["wcat3"].shape, lambda b: (0, 0)),
            pl.BlockSpec(params["w2_row"].shape, lambda b: (0, 0)),
            pl.BlockSpec(params["wfc_t"].shape, lambda b: (0, 0)),
            pl.BlockSpec(params["bfc_row"].shape, lambda b: (0, 0)),
        ],
        out_specs=pl.BlockSpec((None, L, hidden), lambda b: (b, 0, 0)),
        scratch_shapes=[
            pltpu.VMEM((L, 8 * h_dir), jnp.float32),   # packed gate projections
            pltpu.VMEM((L, h_dir), jnp.float32),       # forward hidden sequence
            pltpu.VMEM((L, h_dir), jnp.float32),       # backward hidden sequence
        ],
        compiler_params=pltpu.CompilerParams(
            dimension_semantics=("parallel",)),
    )(queries, dep, params["wih_cat"], params["whh_blk"], params["b_cat"],
      params["wcat3"], params["w2_row"], params["wfc_t"], params["bfc_row"])

    return jnp.transpose(out, (0, 2, 1))               # [B, hidden_size, L]


# ----------------------------------------------------------------------------
# Deterministic parameter initialization.  Raw weights follow the PyTorch
# layout (gate row order i, f, g, o); packed layouts are what the kernel uses.
# ----------------------------------------------------------------------------
def init_params(key, input_size, qh_size, hidden_size):
    h_dir = qh_size // 2
    D = qh_size
    keys = jax.random.split(key, 12)

    def u(k, shape, fan_in):
        bound = 1.0 / jnp.sqrt(jnp.float32(fan_in))
        return jax.random.uniform(k, shape, jnp.float32, -bound, bound)

    # LSTM (bidirectional, 1 layer), PyTorch layout [4H, in]
    wih_f = u(keys[0], (4 * h_dir, input_size), h_dir)
    whh_f = u(keys[1], (4 * h_dir, h_dir), h_dir)
    bih_f = u(keys[2], (4 * h_dir,), h_dir)
    bhh_f = u(keys[3], (4 * h_dir,), h_dir)
    wih_b = u(keys[4], (4 * h_dir, input_size), h_dir)
    whh_b = u(keys[5], (4 * h_dir, h_dir), h_dir)
    bih_b = u(keys[6], (4 * h_dir,), h_dir)
    bhh_b = u(keys[7], (4 * h_dir,), h_dir)

    # Syntac_GCN: Linear(2D->D, no bias), Linear(D->1, no bias), wd: Linear(D->D)
    w_wc1 = u(keys[8], (D, 2 * D), 2 * D)
    w_wc2 = u(keys[9], (1, D), D)
    wd = u(keys[10], (D, D), D)

    # fc_query: Linear(D -> hidden_size) with bias
    wfc = u(keys[11], (hidden_size, D), D)
    bfc = jnp.zeros((hidden_size,), jnp.float32)

    # --- pack LSTM weights into the 128-lane gate-group layout -----------
    bsum_f = bih_f + bhh_f
    bsum_b = bih_b + bhh_b
    wih_cols, b_cols = [], []
    for k in range(4):                       # gate k = i, f, g, o
        wih_cols.append(wih_f[k * h_dir:(k + 1) * h_dir, :].T)   # fwd gate k
        wih_cols.append(wih_b[k * h_dir:(k + 1) * h_dir, :].T)   # bwd gate k
        b_cols.append(bsum_f[k * h_dir:(k + 1) * h_dir])
        b_cols.append(bsum_b[k * h_dir:(k + 1) * h_dir])
    wih_cat = jnp.concatenate(wih_cols, axis=1)                  # [I, 8H]
    b_cat = jnp.concatenate(b_cols)[None, :]                     # [1, 8H]

    whh_blk = jnp.zeros((2 * h_dir, 8 * h_dir), jnp.float32)
    for k in range(4):
        whh_blk = whh_blk.at[:h_dir, (2 * k) * h_dir:(2 * k + 1) * h_dir].set(
            whh_f[k * h_dir:(k + 1) * h_dir, :].T)
        whh_blk = whh_blk.at[h_dir:, (2 * k + 1) * h_dir:(2 * k + 2) * h_dir].set(
            whh_b[k * h_dir:(k + 1) * h_dir, :].T)

    # --- pack GCN projections into a single [D, 3D] matrix ----------------
    wcat3 = jnp.concatenate([w_wc1[:, :D].T, w_wc1[:, D:].T, wd.T], axis=1)

    return dict(
        wih_cat=wih_cat, whh_blk=whh_blk, b_cat=b_cat,
        wcat3=wcat3, w2_row=w_wc2,
        wfc_t=wfc.T, bfc_row=bfc[None, :],
        raw=dict(wih_f=wih_f, whh_f=whh_f, bih_f=bih_f, bhh_f=bhh_f,
                 wih_b=wih_b, whh_b=whh_b, bih_b=bih_b, bhh_b=bhh_b,
                 w_wc1=w_wc1, w_wc2=w_wc2, wd=wd, wfc=wfc, bfc=bfc),
    )


# ----------------------------------------------------------------------------
# Pure-JAX (XLA) reference of the module forward, used for a correctness check.
# ----------------------------------------------------------------------------
def reference_forward(raw, queries, syntactic_dep, num_gcn_layers=2, skip=False):
    hp = jax.lax.Precision.HIGHEST
    B, L, _ = queries.shape
    dep = syntactic_dep[:, :L, :L]
    Hd = raw["whh_f"].shape[1]
    D = 2 * Hd

    def lstm_dir(x, wih, whh, bih, bhh):
        def step(carry, xt):
            h, c = carry
            g = (jnp.dot(xt, wih.T, precision=hp)
                 + jnp.dot(h, whh.T, precision=hp) + bih + bhh)
            i = jax.nn.sigmoid(g[:Hd])
            f = jax.nn.sigmoid(g[Hd:2 * Hd])
            gg = jnp.tanh(g[2 * Hd:3 * Hd])
            o = jax.nn.sigmoid(g[3 * Hd:])
            c = f * c + i * gg
            h = o * jnp.tanh(c)
            return (h, c), h
        _, hs = lax.scan(step, (jnp.zeros((Hd,), jnp.float32),
                                jnp.zeros((Hd,), jnp.float32)), x)
        return hs

    outs = []
    for b in range(B):
        x = queries[b]
        hf = lstm_dir(x, raw["wih_f"], raw["whh_f"], raw["bih_f"], raw["bhh_f"])
        hb = lstm_dir(x[::-1], raw["wih_b"], raw["whh_b"], raw["bih_b"],
                      raw["bhh_b"])[::-1]
        q = jnp.concatenate([hf, hb], axis=-1)
        d = dep[b]
        edge = d != 0.0
        for _ in range(num_gcn_layers):
            hi = jnp.dot(q, raw["w_wc1"][:, :D].T, precision=hp)
            hj = jnp.dot(q, raw["w_wc1"][:, D:].T, precision=hp)
            s = jnp.maximum(hi[:, None, :] + hj[None, :, :], 0.0)
            t = jnp.einsum("ijd,d->ij", s, raw["w_wc2"][0], precision=hp)
            T = jnp.where(edge, t, -100.0)
            beta = jax.nn.softmax(T, axis=1)
            wd_qj = jnp.dot(q, raw["wd"].T, precision=hp)
            Hmat = wd_qj[None, :, :] * beta[:, :, None]
            Hmat = Hmat * (edge & (d > 0.0))[:, :, None]
            o = jax.nn.relu(q + jnp.sum(Hmat, axis=1))
            if skip:
                o = o + q
            q = o
        y = jax.nn.relu(jnp.dot(q, raw["wfc"].T, precision=hp) + raw["bfc"])
        outs.append(y)
    out = jnp.stack(outs, axis=0)                       # [B, L, hidden]
    return jnp.transpose(out, (0, 2, 1))                # [B, hidden, L]


if __name__ == "__main__":
    B, L = 2, 8
    QUERY_INPUT_SIZE = 16
    QUERY_HIDDEN_SIZE = 32
    HIDDEN_SIZE = 32
    NUM_AGG_LAYERS = 2
    SKIP_CONN = False

    key = jax.random.PRNGKey(0)
    kq, kd = jax.random.split(key, 2)
    queries = jax.random.normal(kq, (B, L, QUERY_INPUT_SIZE), jnp.float32)
    wordlens = jnp.full((B,), L, jnp.int32)
    syntactic_dep = (jax.random.uniform(kd, (B, L, L)) < 0.3).astype(jnp.float32)

    params = init_params(jax.random.PRNGKey(1), QUERY_INPUT_SIZE,
                         QUERY_HIDDEN_SIZE, HIDDEN_SIZE)

    out = lstm_syntacgcn_encoder_forward(
        params, queries, wordlens, syntactic_dep,
        num_gcn_layers=NUM_AGG_LAYERS, skip=SKIP_CONN)
    jax.block_until_ready(out)
    assert out.shape == (B, HIDDEN_SIZE, L), out.shape

    ref = reference_forward(params["raw"], queries, syntactic_dep,
                            num_gcn_layers=NUM_AGG_LAYERS, skip=SKIP_CONN)
    max_diff = float(jnp.max(jnp.abs(out - ref)))
    assert max_diff < 5e-2, f"kernel/reference mismatch, max abs diff={max_diff}"
    print("KERNEL_OK")
</pallas_src>

<mosaic_0001>
module attributes {stable_mosaic.version = 11 : i64} {
  func.func @_encoder_kernel(%arg0: i32, %arg1: memref<1x8x16xf32, #tpu.memory_space<vmem>>, %arg2: memref<1x8x8xf32, #tpu.memory_space<vmem>>, %arg3: memref<16x128xf32, #tpu.memory_space<vmem>>, %arg4: memref<32x128xf32, #tpu.memory_space<vmem>>, %arg5: memref<1x128xf32, #tpu.memory_space<vmem>>, %arg6: memref<32x96xf32, #tpu.memory_space<vmem>>, %arg7: memref<1x32xf32, #tpu.memory_space<vmem>>, %arg8: memref<32x32xf32, #tpu.memory_space<vmem>>, %arg9: memref<1x32xf32, #tpu.memory_space<vmem>>, %arg10: memref<1x8x32xf32, #tpu.memory_space<vmem>>, %arg11: memref<8x128xf32, #tpu.memory_space<vmem>>, %arg12: memref<8x16xf32, #tpu.memory_space<vmem>>, %arg13: memref<8x16xf32, #tpu.memory_space<vmem>>) attributes {dimension_semantics = [#tpu.dimension_semantics<parallel>], iteration_bounds = array<i64: 2>, scalar_prefetch = 0 : i64, scratch_operands = 3 : i64, tpu.core_type = #tpu.core_type<tc>, window_params = [{transform_indices = @transform_0, window_bounds = array<i64: 1, 8, 16>}, {transform_indices = @transform_1, window_bounds = array<i64: 1, 8, 8>}, {pipeline_mode = #tpu.pipeline_mode<synchronous>, transform_indices = @transform_2, window_bounds = array<i64: 16, 128>}, {pipeline_mode = #tpu.pipeline_mode<synchronous>, transform_indices = @transform_3, window_bounds = array<i64: 32, 128>}, {pipeline_mode = #tpu.pipeline_mode<synchronous>, transform_indices = @transform_4, window_bounds = array<i64: 1, 128>}, {pipeline_mode = #tpu.pipeline_mode<synchronous>, transform_indices = @transform_5, window_bounds = array<i64: 32, 96>}, {pipeline_mode = #tpu.pipeline_mode<synchronous>, transform_indices = @transform_6, window_bounds = array<i64: 1, 32>}, {pipeline_mode = #tpu.pipeline_mode<synchronous>, transform_indices = @transform_7, window_bounds = array<i64: 32, 32>}, {pipeline_mode = #tpu.pipeline_mode<synchronous>, transform_indices = @transform_8, window_bounds = array<i64: 1, 32>}, {transform_indices = @transform_9, window_bounds = array<i64: 1, 8, 32>}]} {
    %c0 = arith.constant 0 : index
    %c0_0 = arith.constant 0 : index
    %c0_1 = arith.constant 0 : index
    %0 = vector.load %arg1[%c0, %c0_0, %c0_1] : memref<1x8x16xf32, #tpu.memory_space<vmem>>, vector<1x8x16xf32>
    %1 = vector.shape_cast %0 : vector<1x8x16xf32> to vector<8x16xf32>
    %c0_2 = arith.constant 0 : index
    %c0_3 = arith.constant 0 : index
    %2 = vector.load %arg3[%c0_2, %c0_3] : memref<16x128xf32, #tpu.memory_space<vmem>>, vector<16x128xf32>
    %cst = arith.constant dense<0.000000e+00> : vector<8x128xf32>
    %3 = tpu.matmul %1, %2, %cst {dimension_numbers = #tpu.dot_dimension_numbers<[1], [0], [0], [1], [0, 0, 1, 1], [], []>} : vector<8x16xf32>, vector<16x128xf32>, vector<8x128xf32> -> vector<8x128xf32>
    %c0_4 = arith.constant 0 : index
    %c0_5 = arith.constant 0 : index
    %4 = vector.load %arg5[%c0_4, %c0_5] : memref<1x128xf32, #tpu.memory_space<vmem>>, vector<1x128xf32>
    %5 = vector.broadcast %4 : vector<1x128xf32> to vector<8x128xf32>
    %6 = arith.addf %3, %5 : vector<8x128xf32>
    %c0_6 = arith.constant 0 : index
    %c0_7 = arith.constant 0 : index
    %7 = vector.load %arg11[%c0_6, %c0_7] : memref<8x128xf32, #tpu.memory_space<vmem>>, vector<8x128xf32>
    tpu.vector_store %arg11[%c0_6, %c0_7], %6 {strides = array<i32>} : memref<8x128xf32, #tpu.memory_space<vmem>>, vector<8x128xf32>,
    %c0_8 = arith.constant 0 : index
    %c0_9 = arith.constant 0 : index
    %8 = vector.load %arg4[%c0_8, %c0_9] : memref<32x128xf32, #tpu.memory_space<vmem>>, vector<32x128xf32>
    %9 = tpu.iota {dimensions = array<i32: 1>} : vector<1x128xi32>
    %c32_i32 = arith.constant 32 : i32
    %c0_i32 = arith.constant 0 : i32
    %10 = arith.cmpi eq, %c32_i32, %c0_i32 : i32
    %c1_i32 = arith.constant 1 : i32
    %11 = arith.select %10, %c1_i32, %c32_i32 : i32
    %12 = vector.broadcast %11 : i32 to vector<1x128xi32>
    %13 = arith.remsi %9, %12 : vector<1x128xi32>
    %c0_i32_10 = arith.constant 0 : i32
    %14 = vector.broadcast %c0_i32_10 : i32 to vector<1x128xi32>
    %15 = arith.cmpi ne, %13, %14 : vector<1x128xi32>
    %c0_i32_11 = arith.constant 0 : i32
    %16 = vector.broadcast %c0_i32_11 : i32 to vector<1x128xi32>
    %17 = arith.cmpi slt, %13, %16 : vector<1x128xi32>
    %c0_i32_12 = arith.constant 0 : i32
    %18 = arith.cmpi slt, %11, %c0_i32_12 : i32
    %19 = vector.broadcast %18 : i1 to vector<1x128xi1>
    %20 = vector.broadcast %19 : vector<1x128xi1> to vector<1x128xi1>
    %21 = arith.xori %17, %20 : vector<1x128xi1>
    %22 = arith.andi %21, %15 : vector<1x128xi1>
    %23 = vector.broadcast %11 : i32 to vector<1x128xi32>
    %24 = arith.addi %13, %23 : vector<1x128xi32>
    %25 = arith.select %22, %24, %13 : vector<1x128xi1>, vector<1x128xi32>
    %c16_i32 = arith.constant 16 : i32
    %26 = vector.broadcast %c16_i32 : i32 to vector<1x128xi32>
    %27 = arith.cmpi slt, %25, %26 : vector<1x128xi32>
    %cst_13 = arith.constant 0.000000e+00 : f32
    %28 = vector.broadcast %cst_13 : f32 to vector<1x32xf32>
    %cst_14 = arith.constant 0.000000e+00 : f32
    %29 = vector.broadcast %cst_14 : f32 to vector<1x32xf32>
    %c0_15 = arith.constant 0 : index
    %c0_16 = arith.constant 0 : index
    %30 = vector.load %arg11[%c0_15, %c0_16] : memref<8x128xf32, #tpu.memory_space<vmem>>, vector<1x128xf32>
    %c7 = arith.constant 7 : index
    %c0_17 = arith.constant 0 : index
    %31 = vector.load %arg11[%c7, %c0_17] : memref<8x128xf32, #tpu.memory_space<vmem>>, vector<1x128xf32>
    %32 = arith.select %27, %30, %31 : vector<1x128xi1>, vector<1x128xf32>
    %cst_18 = arith.constant dense<0.000000e+00> : vector<1x128xf32>
    %33 = tpu.matmul %28, %8, %cst_18 {dimension_numbers = #tpu.dot_dimension_numbers<[1], [0], [0], [1], [0, 0, 1, 1], [], []>} : vector<1x32xf32>, vector<32x128xf32>, vector<1x128xf32> -> vector<1x128xf32>
    %34 = arith.addf %32, %33 : vector<1x128xf32>
    %35 = vector.extract_strided_slice %34 {offsets = [0, 0], sizes = [1, 32], strides = [1, 1]} : vector<1x128xf32> to vector<1x32xf32>
    %36 = arith.negf %35 : vector<1x32xf32>
    %37 = math.exp %36 : vector<1x32xf32>
    %cst_19 = arith.constant 1.000000e+00 : f32
    %38 = vector.broadcast %cst_19 : f32 to vector<1x32xf32>
    %39 = arith.addf %38, %37 : vector<1x32xf32>
    %40 = arith.divf %38, %39 : vector<1x32xf32>
    %41 = vector.extract_strided_slice %34 {offsets = [0, 32], sizes = [1, 32], strides = [1, 1]} : vector<1x128xf32> to vector<1x32xf32>
    %42 = arith.negf %41 : vector<1x32xf32>
    %43 = math.exp %42 : vector<1x32xf32>
    %cst_20 = arith.constant 1.000000e+00 : f32
    %44 = vector.broadcast %cst_20 : f32 to vector<1x32xf32>
    %45 = arith.addf %44, %43 : vector<1x32xf32>
    %46 = arith.divf %44, %45 : vector<1x32xf32>
    %47 = vector.extract_strided_slice %34 {offsets = [0, 64], sizes = [1, 32], strides = [1, 1]} : vector<1x128xf32> to vector<1x32xf32>
    %48 = math.tanh %47 : vector<1x32xf32>
    %49 = vector.extract_strided_slice %34 {offsets = [0, 96], sizes = [1, 32], strides = [1, 1]} : vector<1x128xf32> to vector<1x32xf32>
    %50 = arith.negf %49 : vector<1x32xf32>
    %51 = math.exp %50 : vector<1x32xf32>
    %cst_21 = arith.constant 1.000000e+00 : f32
    %52 = vector.broadcast %cst_21 : f32 to vector<1x32xf32>
    %53 = arith.addf %52, %51 : vector<1x32xf32>
    %54 = arith.divf %52, %53 : vector<1x32xf32>
    %55 = arith.mulf %46, %29 : vector<1x32xf32>
    %56 = arith.mulf %40, %48 : vector<1x32xf32>
    %57 = arith.addf %55, %56 : vector<1x32xf32>
    %58 = math.tanh %57 : vector<1x32xf32>
    %59 = arith.mulf %54, %58 : vector<1x32xf32>
    %60 = vector.extract_strided_slice %59 {offsets = [0, 0], sizes = [1, 16], strides = [1, 1]} : vector<1x32xf32> to vector<1x16xf32>
    %c0_22 = arith.constant 0 : index
    %c0_23 = arith.constant 0 : index
    %61 = vector.load %arg12[%c0_22, %c0_23] : memref<8x16xf32, #tpu.memory_space<vmem>>, vector<1x16xf32>
    tpu.vector_store %arg12[%c0_22, %c0_23], %60 {strides = array<i32>} : memref<8x16xf32, #tpu.memory_space<vmem>>, vector<1x16xf32>,
    %62 = vector.extract_strided_slice %59 {offsets = [0, 16], sizes = [1, 16], strides = [1, 1]} : vector<1x32xf32> to vector<1x16xf32>
    %c7_24 = arith.constant 7 : index
    %c0_25 = arith.constant 0 : index
    %63 = vector.load %arg13[%c7_24, %c0_25] : memref<8x16xf32, #tpu.memory_space<vmem>>, vector<1x16xf32>
    tpu.vector_store %arg13[%c7_24, %c0_25], %62 {strides = array<i32>} : memref<8x16xf32, #tpu.memory_space<vmem>>, vector<1x16xf32>,
    %c1 = arith.constant 1 : index
    %c0_26 = arith.constant 0 : index
    %64 = vector.load %arg11[%c1, %c0_26] : memref<8x128xf32, #tpu.memory_space<vmem>>, vector<1x128xf32>
    %c6 = arith.constant 6 : index
    %c0_27 = arith.constant 0 : index
    %65 = vector.load %arg11[%c6, %c0_27] : memref<8x128xf32, #tpu.memory_space<vmem>>, vector<1x128xf32>
    %66 = arith.select %27, %64, %65 : vector<1x128xi1>, vector<1x128xf32>
    %cst_28 = arith.constant dense<0.000000e+00> : vector<1x128xf32>
    %67 = tpu.matmul %59, %8, %cst_28 {dimension_numbers = #tpu.dot_dimension_numbers<[1], [0], [0], [1], [0, 0, 1, 1], [], []>} : vector<1x32xf32>, vector<32x128xf32>, vector<1x128xf32> -> vector<1x128xf32>
    %68 = arith.addf %66, %67 : vector<1x128xf32>
    %69 = vector.extract_strided_slice %68 {offsets = [0, 0], sizes = [1, 32], strides = [1, 1]} : vector<1x128xf32> to vector<1x32xf32>
    %70 = arith.negf %69 : vector<1x32xf32>
    %71 = math.exp %70 : vector<1x32xf32>
    %cst_29 = arith.constant 1.000000e+00 : f32
    %72 = vector.broadcast %cst_29 : f32 to vector<1x32xf32>
    %73 = arith.addf %72, %71 : vector<1x32xf32>
    %74 = arith.divf %72, %73 : vector<1x32xf32>
    %75 = vector.extract_strided_slice %68 {offsets = [0, 32], sizes = [1, 32], strides = [1, 1]} : vector<1x128xf32> to vector<1x32xf32>
    %76 = arith.negf %75 : vector<1x32xf32>
    %77 = math.exp %76 : vector<1x32xf32>
    %cst_30 = arith.constant 1.000000e+00 : f32
    %78 = vector.broadcast %cst_30 : f32 to vector<1x32xf32>
    %79 = arith.addf %78, %77 : vector<1x32xf32>
    %80 = arith.divf %78, %79 : vector<1x32xf32>
    %81 = vector.extract_strided_slice %68 {offsets = [0, 64], sizes = [1, 32], strides = [1, 1]} : vector<1x128xf32> to vector<1x32xf32>
    %82 = math.tanh %81 : vector<1x32xf32>
    %83 = vector.extract_strided_slice %68 {offsets = [0, 96], sizes = [1, 32], strides = [1, 1]} : vector<1x128xf32> to vector<1x32xf32>
    %84 = arith.negf %83 : vector<1x32xf32>
    %85 = math.exp %84 : vector<1x32xf32>
    %cst_31 = arith.constant 1.000000e+00 : f32
    %86 = vector.broadcast %cst_31 : f32 to vector<1x32xf32>
    %87 = arith.addf %86, %85 : vector<1x32xf32>
    %88 = arith.divf %86, %87 : vector<1x32xf32>
    %89 = arith.mulf %80, %57 : vector<1x32xf32>
    %90 = arith.mulf %74, %82 : vector<1x32xf32>
    %91 = arith.addf %89, %90 : vector<1x32xf32>
    %92 = math.tanh %91 : vector<1x32xf32>
    %93 = arith.mulf %88, %92 : vector<1x32xf32>
    %94 = vector.extract_strided_slice %93 {offsets = [0, 0], sizes = [1, 16], strides = [1, 1]} : vector<1x32xf32> to vector<1x16xf32>
    %c1_32 = arith.constant 1 : index
    %c0_33 = arith.constant 0 : index
    %95 = vector.load %arg12[%c1_32, %c0_33] : memref<8x16xf32, #tpu.memory_space<vmem>>, vector<1x16xf32>
    tpu.vector_store %arg12[%c1_32, %c0_33], %94 {strides = array<i32>} : memref<8x16xf32, #tpu.memory_space<vmem>>, vector<1x16xf32>,
    %96 = vector.extract_strided_slice %93 {offsets = [0, 16], sizes = [1, 16], strides = [1, 1]} : vector<1x32xf32> to vector<1x16xf32>
    %c6_34 = arith.constant 6 : index
    %c0_35 = arith.constant 0 : index
    %97 = vector.load %arg13[%c6_34, %c0_35] : memref<8x16xf32, #tpu.memory_space<vmem>>, vector<1x16xf32>
    tpu.vector_store %arg13[%c6_34, %c0_35], %96 {strides = array<i32>} : memref<8x16xf32, #tpu.memory_space<vmem>>, vector<1x16xf32>,
    %c2 = arith.constant 2 : index
    %c0_36 = arith.constant 0 : index
    %98 = vector.load %arg11[%c2, %c0_36] : memref<8x128xf32, #tpu.memory_space<vmem>>, vector<1x128xf32>
    %c5 = arith.constant 5 : index
    %c0_37 = arith.constant 0 : index
    %99 = vector.load %arg11[%c5, %c0_37] : memref<8x128xf32, #tpu.memory_space<vmem>>, vector<1x128xf32>
    %100 = arith.select %27, %98, %99 : vector<1x128xi1>, vector<1x128xf32>
    %cst_38 = arith.constant dense<0.000000e+00> : vector<1x128xf32>
    %101 = tpu.matmul %93, %8, %cst_38 {dimension_numbers = #tpu.dot_dimension_numbers<[1], [0], [0], [1], [0, 0, 1, 1], [], []>} : vector<1x32xf32>, vector<32x128xf32>, vector<1x128xf32> -> vector<1x128xf32>
    %102 = arith.addf %100, %101 : vector<1x128xf32>
    %103 = vector.extract_strided_slice %102 {offsets = [0, 0], sizes = [1, 32], strides = [1, 1]} : vector<1x128xf32> to vector<1x32xf32>
    %104 = arith.negf %103 : vector<1x32xf32>
    %105 = math.exp %104 : vector<1x32xf32>
    %cst_39 = arith.constant 1.000000e+00 : f32
    %106 = vector.broadcast %cst_39 : f32 to vector<1x32xf32>
    %107 = arith.addf %106, %105 : vector<1x32xf32>
    %108 = arith.divf %106, %107 : vector<1x32xf32>
    %109 = vector.extract_strided_slice %102 {offsets = [0, 32], sizes = [1, 32], strides = [1, 1]} : vector<1x128xf32> to vector<1x32xf32>
    %110 = arith.negf %109 : vector<1x32xf32>
    %111 = math.exp %110 : vector<1x32xf32>
    %cst_40 = arith.constant 1.000000e+00 : f32
    %112 = vector.broadcast %cst_40 : f32 to vector<1x32xf32>
    %113 = arith.addf %112, %111 : vector<1x32xf32>
    %114 = arith.divf %112, %113 : vector<1x32xf32>
    %115 = vector.extract_strided_slice %102 {offsets = [0, 64], sizes = [1, 32], strides = [1, 1]} : vector<1x128xf32> to vector<1x32xf32>
    %116 = math.tanh %115 : vector<1x32xf32>
    %117 = vector.extract_strided_slice %102 {offsets = [0, 96], sizes = [1, 32], strides = [1, 1]} : vector<1x128xf32> to vector<1x32xf32>
    %118 = arith.negf %117 : vector<1x32xf32>
    %119 = math.exp %118 : vector<1x32xf32>
    %cst_41 = arith.constant 1.000000e+00 : f32
    %120 = vector.broadcast %cst_41 : f32 to vector<1x32xf32>
    %121 = arith.addf %120, %119 : vector<1x32xf32>
    %122 = arith.divf %120, %121 : vector<1x32xf32>
    %123 = arith.mulf %114, %91 : vector<1x32xf32>
    %124 = arith.mulf %108, %116 : vector<1x32xf32>
    %125 = arith.addf %123, %124 : vector<1x32xf32>
    %126 = math.tanh %125 : vector<1x32xf32>
    %127 = arith.mulf %122, %126 : vector<1x32xf32>
    %128 = vector.extract_strided_slice %127 {offsets = [0, 0], sizes = [1, 16], strides = [1, 1]} : vector<1x32xf32> to vector<1x16xf32>
    %c2_42 = arith.constant 2 : index
    %c0_43 = arith.constant 0 : index
    %129 = vector.load %arg12[%c2_42, %c0_43] : memref<8x16xf32, #tpu.memory_space<vmem>>, vector<1x16xf32>
    tpu.vector_store %arg12[%c2_42, %c0_43], %128 {strides = array<i32>} : memref<8x16xf32, #tpu.memory_space<vmem>>, vector<1x16xf32>,
    %130 = vector.extract_strided_slice %127 {offsets = [0, 16], sizes = [1, 16], strides = [1, 1]} : vector<1x32xf32> to vector<1x16xf32>
    %c5_44 = arith.constant 5 : index
    %c0_45 = arith.constant 0 : index
    %131 = vector.load %arg13[%c5_44, %c0_45] : memref<8x16xf32, #tpu.memory_space<vmem>>, vector<1x16xf32>
    tpu.vector_store %arg13[%c5_44, %c0_45], %130 {strides = array<i32>} : memref<8x16xf32, #tpu.memory_space<vmem>>, vector<1x16xf32>,
    %c3 = arith.constant 3 : index
    %c0_46 = arith.constant 0 : index
    %132 = vector.load %arg11[%c3, %c0_46] : memref<8x128xf32, #tpu.memory_space<vmem>>, vector<1x128xf32>
    %c4 = arith.constant 4 : index
    %c0_47 = arith.constant 0 : index
    %133 = vector.load %arg11[%c4, %c0_47] : memref<8x128xf32, #tpu.memory_space<vmem>>, vector<1x128xf32>
    %134 = arith.select %27, %132, %133 : vector<1x128xi1>, vector<1x128xf32>
    %cst_48 = arith.constant dense<0.000000e+00> : vector<1x128xf32>
    %135 = tpu.matmul %127, %8, %cst_48 {dimension_numbers = #tpu.dot_dimension_numbers<[1], [0], [0], [1], [0, 0, 1, 1], [], []>} : vector<1x32xf32>, vector<32x128xf32>, vector<1x128xf32> -> vector<1x128xf32>
    %136 = arith.addf %134, %135 : vector<1x128xf32>
    %137 = vector.extract_strided_slice %136 {offsets = [0, 0], sizes = [1, 32], strides = [1, 1]} : vector<1x128xf32> to vector<1x32xf32>
    %138 = arith.negf %137 : vector<1x32xf32>
    %139 = math.exp %138 : vector<1x32xf32>
    %cst_49 = arith.constant 1.000000e+00 : f32
    %140 = vector.broadcast %cst_49 : f32 to vector<1x32xf32>
    %141 = arith.addf %140, %139 : vector<1x32xf32>
    %142 = arith.divf %140, %141 : vector<1x32xf32>
    %143 = vector.extract_strided_slice %136 {offsets = [0, 32], sizes = [1, 32], strides = [1, 1]} : vector<1x128xf32> to vector<1x32xf32>
    %144 = arith.negf %143 : vector<1x32xf32>
    %145 = math.exp %144 : vector<1x32xf32>
    %cst_50 = arith.constant 1.000000e+00 : f32
    %146 = vector.broadcast %cst_50 : f32 to vector<1x32xf32>
    %147 = arith.addf %146, %145 : vector<1x32xf32>
    %148 = arith.divf %146, %147 : vector<1x32xf32>
    %149 = vector.extract_strided_slice %136 {offsets = [0, 64], sizes = [1, 32], strides = [1, 1]} : vector<1x128xf32> to vector<1x32xf32>
    %150 = math.tanh %149 : vector<1x32xf32>
    %151 = vector.extract_strided_slice %136 {offsets = [0, 96], sizes = [1, 32], strides = [1, 1]} : vector<1x128xf32> to vector<1x32xf32>
    %152 = arith.negf %151 : vector<1x32xf32>
    %153 = math.exp %152 : vector<1x32xf32>
    %cst_51 = arith.constant 1.000000e+00 : f32
    %154 = vector.broadcast %cst_51 : f32 to vector<1x32xf32>
    %155 = arith.addf %154, %153 : vector<1x32xf32>
    %156 = arith.divf %154, %155 : vector<1x32xf32>
    %157 = arith.mulf %148, %125 : vector<1x32xf32>
    %158 = arith.mulf %142, %150 : vector<1x32xf32>
    %159 = arith.addf %157, %158 : vector<1x32xf32>
    %160 = math.tanh %159 : vector<1x32xf32>
    %161 = arith.mulf %156, %160 : vector<1x32xf32>
    %162 = vector.extract_strided_slice %161 {offsets = [0, 0], sizes = [1, 16], strides = [1, 1]} : vector<1x32xf32> to vector<1x16xf32>
    %c3_52 = arith.constant 3 : index
    %c0_53 = arith.constant 0 : index
    %163 = vector.load %arg12[%c3_52, %c0_53] : memref<8x16xf32, #tpu.memory_space<vmem>>, vector<1x16xf32>
    tpu.vector_store %arg12[%c3_52, %c0_53], %162 {strides = array<i32>} : memref<8x16xf32, #tpu.memory_space<vmem>>, vector<1x16xf32>,
    %164 = vector.extract_strided_slice %161 {offsets = [0, 16], sizes = [1, 16], strides = [1, 1]} : vector<1x32xf32> to vector<1x16xf32>
    %c4_54 = arith.constant 4 : index
    %c0_55 = arith.constant 0 : index
    %165 = vector.load %arg13[%c4_54, %c0_55] : memref<8x16xf32, #tpu.memory_space<vmem>>, vector<1x16xf32>
    tpu.vector_store %arg13[%c4_54, %c0_55], %164 {strides = array<i32>} : memref<8x16xf32, #tpu.memory_space<vmem>>, vector<1x16xf32>,
    %c4_56 = arith.constant 4 : index
    %c0_57 = arith.constant 0 : index
    %166 = vector.load %arg11[%c4_56, %c0_57] : memref<8x128xf32, #tpu.memory_space<vmem>>, vector<1x128xf32>
    %c3_58 = arith.constant 3 : index
    %c0_59 = arith.constant 0 : index
    %167 = vector.load %arg11[%c3_58, %c0_59] : memref<8x128xf32, #tpu.memory_space<vmem>>, vector<1x128xf32>
    %168 = arith.select %27, %166, %167 : vector<1x128xi1>, vector<1x128xf32>
    %cst_60 = arith.constant dense<0.000000e+00> : vector<1x128xf32>
    %169 = tpu.matmul %161, %8, %cst_60 {dimension_numbers = #tpu.dot_dimension_numbers<[1], [0], [0], [1], [0, 0, 1, 1], [], []>} : vector<1x32xf32>, vector<32x128xf32>, vector<1x128xf32> -> vector<1x128xf32>
    %170 = arith.addf %168, %169 : vector<1x128xf32>
    %171 = vector.extract_strided_slice %170 {offsets = [0, 0], sizes = [1, 32], strides = [1, 1]} : vector<1x128xf32> to vector<1x32xf32>
    %172 = arith.negf %171 : vector<1x32xf32>
    %173 = math.exp %172 : vector<1x32xf32>
    %cst_61 = arith.constant 1.000000e+00 : f32
    %174 = vector.broadcast %cst_61 : f32 to vector<1x32xf32>
    %175 = arith.addf %174, %173 : vector<1x32xf32>
    %176 = arith.divf %174, %175 : vector<1x32xf32>
    %177 = vector.extract_strided_slice %170 {offsets = [0, 32], sizes = [1, 32], strides = [1, 1]} : vector<1x128xf32> to vector<1x32xf32>
    %178 = arith.negf %177 : vector<1x32xf32>
    %179 = math.exp %178 : vector<1x32xf32>
    %cst_62 = arith.constant 1.000000e+00 : f32
    %180 = vector.broadcast %cst_62 : f32 to vector<1x32xf32>
    %181 = arith.addf %180, %179 : vector<1x32xf32>
    %182 = arith.divf %180, %181 : vector<1x32xf32>
    %183 = vector.extract_strided_slice %170 {offsets = [0, 64], sizes = [1, 32], strides = [1, 1]} : vector<1x128xf32> to vector<1x32xf32>
    %184 = math.tanh %183 : vector<1x32xf32>
    %185 = vector.extract_strided_slice %170 {offsets = [0, 96], sizes = [1, 32], strides = [1, 1]} : vector<1x128xf32> to vector<1x32xf32>
    %186 = arith.negf %185 : vector<1x32xf32>
    %187 = math.exp %186 : vector<1x32xf32>
    %cst_63 = arith.constant 1.000000e+00 : f32
    %188 = vector.broadcast %cst_63 : f32 to vector<1x32xf32>
    %189 = arith.addf %188, %187 : vector<1x32xf32>
    %190 = arith.divf %188, %189 : vector<1x32xf32>
    %191 = arith.mulf %182, %159 : vector<1x32xf32>
    %192 = arith.mulf %176, %184 : vector<1x32xf32>
    %193 = arith.addf %191, %192 : vector<1x32xf32>
    %194 = math.tanh %193 : vector<1x32xf32>
    %195 = arith.mulf %190, %194 : vector<1x32xf32>
    %196 = vector.extract_strided_slice %195 {offsets = [0, 0], sizes = [1, 16], strides = [1, 1]} : vector<1x32xf32> to vector<1x16xf32>
    %c4_64 = arith.constant 4 : index
    %c0_65 = arith.constant 0 : index
    %197 = vector.load %arg12[%c4_64, %c0_65] : memref<8x16xf32, #tpu.memory_space<vmem>>, vector<1x16xf32>
    tpu.vector_store %arg12[%c4_64, %c0_65], %196 {strides = array<i32>} : memref<8x16xf32, #tpu.memory_space<vmem>>, vector<1x16xf32>,
    %198 = vector.extract_strided_slice %195 {offsets = [0, 16], sizes = [1, 16], strides = [1, 1]} : vector<1x32xf32> to vector<1x16xf32>
    %c3_66 = arith.constant 3 : index
    %c0_67 = arith.constant 0 : index
    %199 = vector.load %arg13[%c3_66, %c0_67] : memref<8x16xf32, #tpu.memory_space<vmem>>, vector<1x16xf32>
    tpu.vector_store %arg13[%c3_66, %c0_67], %198 {strides = array<i32>} : memref<8x16xf32, #tpu.memory_space<vmem>>, vector<1x16xf32>,
    %c5_68 = arith.constant 5 : index
    %c0_69 = arith.constant 0 : index
    %200 = vector.load %arg11[%c5_68, %c0_69] : memref<8x128xf32, #tpu.memory_space<vmem>>, vector<1x128xf32>
    %c2_70 = arith.constant 2 : index
    %c0_71 = arith.constant 0 : index
    %201 = vector.load %arg11[%c2_70, %c0_71] : memref<8x128xf32, #tpu.memory_space<vmem>>, vector<1x128xf32>
    %202 = arith.select %27, %200, %201 : vector<1x128xi1>, vector<1x128xf32>
    %cst_72 = arith.constant dense<0.000000e+00> : vector<1x128xf32>
    %203 = tpu.matmul %195, %8, %cst_72 {dimension_numbers = #tpu.dot_dimension_numbers<[1], [0], [0], [1], [0, 0, 1, 1], [], []>} : vector<1x32xf32>, vector<32x128xf32>, vector<1x128xf32> -> vector<1x128xf32>
    %204 = arith.addf %202, %203 : vector<1x128xf32>
    %205 = vector.extract_strided_slice %204 {offsets = [0, 0], sizes = [1, 32], strides = [1, 1]} : vector<1x128xf32> to vector<1x32xf32>
    %206 = arith.negf %205 : vector<1x32xf32>
    %207 = math.exp %206 : vector<1x32xf32>
    %cst_73 = arith.constant 1.000000e+00 : f32
    %208 = vector.broadcast %cst_73 : f32 to vector<1x32xf32>
    %209 = arith.addf %208, %207 : vector<1x32xf32>
    %210 = arith.divf %208, %209 : vector<1x32xf32>
    %211 = vector.extract_strided_slice %204 {offsets = [0, 32], sizes = [1, 32], strides = [1, 1]} : vector<1x128xf32> to vector<1x32xf32>
    %212 = arith.negf %211 : vector<1x32xf32>
    %213 = math.exp %212 : vector<1x32xf32>
    %cst_74 = arith.constant 1.000000e+00 : f32
    %214 = vector.broadcast %cst_74 : f32 to vector<1x32xf32>
    %215 = arith.addf %214, %213 : vector<1x32xf32>
    %216 = arith.divf %214, %215 : vector<1x32xf32>
    %217 = vector.extract_strided_slice %204 {offsets = [0, 64], sizes = [1, 32], strides = [1, 1]} : vector<1x128xf32> to vector<1x32xf32>
    %218 = math.tanh %217 : vector<1x32xf32>
    %219 = vector.extract_strided_slice %204 {offsets = [0, 96], sizes = [1, 32], strides = [1, 1]} : vector<1x128xf32> to vector<1x32xf32>
    %220 = arith.negf %219 : vector<1x32xf32>
    %221 = math.exp %220 : vector<1x32xf32>
    %cst_75 = arith.constant 1.000000e+00 : f32
    %222 = vector.broadcast %cst_75 : f32 to vector<1x32xf32>
    %223 = arith.addf %222, %221 : vector<1x32xf32>
    %224 = arith.divf %222, %223 : vector<1x32xf32>
    %225 = arith.mulf %216, %193 : vector<1x32xf32>
    %226 = arith.mulf %210, %218 : vector<1x32xf32>
    %227 = arith.addf %225, %226 : vector<1x32xf32>
    %228 = math.tanh %227 : vector<1x32xf32>
    %229 = arith.mulf %224, %228 : vector<1x32xf32>
    %230 = vector.extract_strided_slice %229 {offsets = [0, 0], sizes = [1, 16], strides = [1, 1]} : vector<1x32xf32> to vector<1x16xf32>
    %c5_76 = arith.constant 5 : index
    %c0_77 = arith.constant 0 : index
    %231 = vector.load %arg12[%c5_76, %c0_77] : memref<8x16xf32, #tpu.memory_space<vmem>>, vector<1x16xf32>
    tpu.vector_store %arg12[%c5_76, %c0_77], %230 {strides = array<i32>} : memref<8x16xf32, #tpu.memory_space<vmem>>, vector<1x16xf32>,
    %232 = vector.extract_strided_slice %229 {offsets = [0, 16], sizes = [1, 16], strides = [1, 1]} : vector<1x32xf32> to vector<1x16xf32>
    %c2_78 = arith.constant 2 : index
    %c0_79 = arith.constant 0 : index
    %233 = vector.load %arg13[%c2_78, %c0_79] : memref<8x16xf32, #tpu.memory_space<vmem>>, vector<1x16xf32>
    tpu.vector_store %arg13[%c2_78, %c0_79], %232 {strides = array<i32>} : memref<8x16xf32, #tpu.memory_space<vmem>>, vector<1x16xf32>,
    %c6_80 = arith.constant 6 : index
    %c0_81 = arith.constant 0 : index
    %234 = vector.load %arg11[%c6_80, %c0_81] : memref<8x128xf32, #tpu.memory_space<vmem>>, vector<1x128xf32>
    %c1_82 = arith.constant 1 : index
    %c0_83 = arith.constant 0 : index
    %235 = vector.load %arg11[%c1_82, %c0_83] : memref<8x128xf32, #tpu.memory_space<vmem>>, vector<1x128xf32>
    %236 = arith.select %27, %234, %235 : vector<1x128xi1>, vector<1x128xf32>
    %cst_84 = arith.constant dense<0.000000e+00> : vector<1x128xf32>
    %237 = tpu.matmul %229, %8, %cst_84 {dimension_numbers = #tpu.dot_dimension_numbers<[1], [0], [0], [1], [0, 0, 1, 1], [], []>} : vector<1x32xf32>, vector<32x128xf32>, vector<1x128xf32> -> vector<1x128xf32>
    %238 = arith.addf %236, %237 : vector<1x128xf32>
    %239 = vector.extract_strided_slice %238 {offsets = [0, 0], sizes = [1, 32], strides = [1, 1]} : vector<1x128xf32> to vector<1x32xf32>
    %240 = arith.negf %239 : vector<1x32xf32>
    %241 = math.exp %240 : vector<1x32xf32>
    %cst_85 = arith.constant 1.000000e+00 : f32
    %242 = vector.broadcast %cst_85 : f32 to vector<1x32xf32>
    %243 = arith.addf %242, %241 : vector<1x32xf32>
    %244 = arith.divf %242, %243 : vector<1x32xf32>
    %245 = vector.extract_strided_slice %238 {offsets = [0, 32], sizes = [1, 32], strides = [1, 1]} : vector<1x128xf32> to vector<1x32xf32>
    %246 = arith.negf %245 : vector<1x32xf32>
    %247 = math.exp %246 : vector<1x32xf32>
    %cst_86 = arith.constant 1.000000e+00 : f32
    %248 = vector.broadcast %cst_86 : f32 to vector<1x32xf32>
    %249 = arith.addf %248, %247 : vector<1x32xf32>
    %250 = arith.divf %248, %249 : vector<1x32xf32>
    %251 = vector.extract_strided_slice %238 {offsets = [0, 64], sizes = [1, 32], strides = [1, 1]} : vector<1x128xf32> to vector<1x32xf32>
    %252 = math.tanh %251 : vector<1x32xf32>
    %253 = vector.extract_strided_slice %238 {offsets = [0, 96], sizes = [1, 32], strides = [1, 1]} : vector<1x128xf32> to vector<1x32xf32>
    %254 = arith.negf %253 : vector<1x32xf32>
    %255 = math.exp %254 : vector<1x32xf32>
    %cst_87 = arith.constant 1.000000e+00 : f32
    %256 = vector.broadcast %cst_87 : f32 to vector<1x32xf32>
    %257 = arith.addf %256, %255 : vector<1x32xf32>
    %258 = arith.divf %256, %257 : vector<1x32xf32>
    %259 = arith.mulf %250, %227 : vector<1x32xf32>
    %260 = arith.mulf %244, %252 : vector<1x32xf32>
    %261 = arith.addf %259, %260 : vector<1x32xf32>
    %262 = math.tanh %261 : vector<1x32xf32>
    %263 = arith.mulf %258, %262 : vector<1x32xf32>
    %264 = vector.extract_strided_slice %263 {offsets = [0, 0], sizes = [1, 16], strides = [1, 1]} : vector<1x32xf32> to vector<1x16xf32>
    %c6_88 = arith.constant 6 : index
    %c0_89 = arith.constant 0 : index
    %265 = vector.load %arg12[%c6_88, %c0_89] : memref<8x16xf32, #tpu.memory_space<vmem>>, vector<1x16xf32>
    tpu.vector_store %arg12[%c6_88, %c0_89], %264 {strides = array<i32>} : memref<8x16xf32, #tpu.memory_space<vmem>>, vector<1x16xf32>,
    %266 = vector.extract_strided_slice %263 {offsets = [0, 16], sizes = [1, 16], strides = [1, 1]} : vector<1x32xf32> to vector<1x16xf32>
    %c1_90 = arith.constant 1 : index
    %c0_91 = arith.constant 0 : index
    %267 = vector.load %arg13[%c1_90, %c0_91] : memref<8x16xf32, #tpu.memory_space<vmem>>, vector<1x16xf32>
    tpu.vector_store %arg13[%c1_90, %c0_91], %266 {strides = array<i32>} : memref<8x16xf32, #tpu.memory_space<vmem>>, vector<1x16xf32>,
    %c7_92 = arith.constant 7 : index
    %c0_93 = arith.constant 0 : index
    %268 = vector.load %arg11[%c7_92, %c0_93] : memref<8x128xf32, #tpu.memory_space<vmem>>, vector<1x128xf32>
    %c0_94 = arith.constant 0 : index
    %c0_95 = arith.constant 0 : index
    %269 = vector.load %arg11[%c0_94, %c0_95] : memref<8x128xf32, #tpu.memory_space<vmem>>, vector<1x128xf32>
    %270 = arith.select %27, %268, %269 : vector<1x128xi1>, vector<1x128xf32>
    %cst_96 = arith.constant dense<0.000000e+00> : vector<1x128xf32>
    %271 = tpu.matmul %263, %8, %cst_96 {dimension_numbers = #tpu.dot_dimension_numbers<[1], [0], [0], [1], [0, 0, 1, 1], [], []>} : vector<1x32xf32>, vector<32x128xf32>, vector<1x128xf32> -> vector<1x128xf32>
    %272 = arith.addf %270, %271 : vector<1x128xf32>
    %273 = vector.extract_strided_slice %272 {offsets = [0, 0], sizes = [1, 32], strides = [1, 1]} : vector<1x128xf32> to vector<1x32xf32>
    %274 = arith.negf %273 : vector<1x32xf32>
    %275 = math.exp %274 : vector<1x32xf32>
    %cst_97 = arith.constant 1.000000e+00 : f32
    %276 = vector.broadcast %cst_97 : f32 to vector<1x32xf32>
    %277 = arith.addf %276, %275 : vector<1x32xf32>
    %278 = arith.divf %276, %277 : vector<1x32xf32>
    %279 = vector.extract_strided_slice %272 {offsets = [0, 32], sizes = [1, 32], strides = [1, 1]} : vector<1x128xf32> to vector<1x32xf32>
    %280 = arith.negf %279 : vector<1x32xf32>
    %281 = math.exp %280 : vector<1x32xf32>
    %cst_98 = arith.constant 1.000000e+00 : f32
    %282 = vector.broadcast %cst_98 : f32 to vector<1x32xf32>
    %283 = arith.addf %282, %281 : vector<1x32xf32>
    %284 = arith.divf %282, %283 : vector<1x32xf32>
    %285 = vector.extract_strided_slice %272 {offsets = [0, 64], sizes = [1, 32], strides = [1, 1]} : vector<1x128xf32> to vector<1x32xf32>
    %286 = math.tanh %285 : vector<1x32xf32>
    %287 = vector.extract_strided_slice %272 {offsets = [0, 96], sizes = [1, 32], strides = [1, 1]} : vector<1x128xf32> to vector<1x32xf32>
    %288 = arith.negf %287 : vector<1x32xf32>
    %289 = math.exp %288 : vector<1x32xf32>
    %cst_99 = arith.constant 1.000000e+00 : f32
    %290 = vector.broadcast %cst_99 : f32 to vector<1x32xf32>
    %291 = arith.addf %290, %289 : vector<1x32xf32>
    %292 = arith.divf %290, %291 : vector<1x32xf32>
    %293 = arith.mulf %284, %261 : vector<1x32xf32>
    %294 = arith.mulf %278, %286 : vector<1x32xf32>
    %295 = arith.addf %293, %294 : vector<1x32xf32>
    %296 = math.tanh %295 : vector<1x32xf32>
    %297 = arith.mulf %292, %296 : vector<1x32xf32>
    %298 = vector.extract_strided_slice %297 {offsets = [0, 0], sizes = [1, 16], strides = [1, 1]} : vector<1x32xf32> to vector<1x16xf32>
    %c7_100 = arith.constant 7 : index
    %c0_101 = arith.constant 0 : index
    %299 = vector.load %arg12[%c7_100, %c0_101] : memref<8x16xf32, #tpu.memory_space<vmem>>, vector<1x16xf32>
    tpu.vector_store %arg12[%c7_100, %c0_101], %298 {strides = array<i32>} : memref<8x16xf32, #tpu.memory_space<vmem>>, vector<1x16xf32>,
    %300 = vector.extract_strided_slice %297 {offsets = [0, 16], sizes = [1, 16], strides = [1, 1]} : vector<1x32xf32> to vector<1x16xf32>
    %c0_102 = arith.constant 0 : index
    %c0_103 = arith.constant 0 : index
    %301 = vector.load %arg13[%c0_102, %c0_103] : memref<8x16xf32, #tpu.memory_space<vmem>>, vector<1x16xf32>
    tpu.vector_store %arg13[%c0_102, %c0_103], %300 {strides = array<i32>} : memref<8x16xf32, #tpu.memory_space<vmem>>, vector<1x16xf32>,
    %c0_104 = arith.constant 0 : index
    %c0_105 = arith.constant 0 : index
    %302 = vector.load %arg12[%c0_104, %c0_105] : memref<8x16xf32, #tpu.memory_space<vmem>>, vector<8x16xf32>
    %c0_106 = arith.constant 0 : index
    %c0_107 = arith.constant 0 : index
    %303 = vector.load %arg13[%c0_106, %c0_107] : memref<8x16xf32, #tpu.memory_space<vmem>>, vector<8x16xf32>
    %304 = tpu.concatenate %302, %303 in 1 : vector<8x16xf32>, vector<8x16xf32> -> vector<8x32xf32>
    %c0_108 = arith.constant 0 : index
    %c0_109 = arith.constant 0 : index
    %c0_110 = arith.constant 0 : index
    %305 = vector.load %arg2[%c0_108, %c0_109, %c0_110] : memref<1x8x8xf32, #tpu.memory_space<vmem>>, vector<1x8x8xf32>
    %306 = vector.shape_cast %305 : vector<1x8x8xf32> to vector<8x8xf32>
    %cst_111 = arith.constant 0.000000e+00 : f32
    %307 = vector.broadcast %cst_111 : f32 to vector<8x8xf32>
    %308 = arith.cmpf one, %306, %307 : vector<8x8xf32>
    %cst_112 = arith.constant 0.000000e+00 : f32
    %309 = vector.broadcast %cst_112 : f32 to vector<8x8xf32>
    %310 = arith.cmpf ogt, %306, %309 : vector<8x8xf32>
    %311 = arith.andi %308, %310 : vector<8x8xi1>
    %c0_113 = arith.constant 0 : index
    %c0_114 = arith.constant 0 : index
    %312 = vector.load %arg6[%c0_113, %c0_114] : memref<32x96xf32, #tpu.memory_space<vmem>>, vector<32x96xf32>
    %c0_115 = arith.constant 0 : index
    %c0_116 = arith.constant 0 : index
    %313 = vector.load %arg7[%c0_115, %c0_116] : memref<1x32xf32, #tpu.memory_space<vmem>>, vector<1x32xf32>
    %cst_117 = arith.constant dense<0.000000e+00> : vector<8x96xf32>
    %314 = tpu.matmul %304, %312, %cst_117 {dimension_numbers = #tpu.dot_dimension_numbers<[1], [0], [0], [1], [0, 0, 1, 1], [], []>} : vector<8x32xf32>, vector<32x96xf32>, vector<8x96xf32> -> vector<8x96xf32>
    %315 = vector.extract_strided_slice %314 {offsets = [0, 0], sizes = [8, 32], strides = [1, 1]} : vector<8x96xf32> to vector<8x32xf32>
    %316 = vector.extract_strided_slice %314 {offsets = [0, 32], sizes = [8, 32], strides = [1, 1]} : vector<8x96xf32> to vector<8x32xf32>
    %317 = vector.extract_strided_slice %314 {offsets = [0, 64], sizes = [8, 32], strides = [1, 1]} : vector<8x96xf32> to vector<8x32xf32>
    %318 = vector.shape_cast %315 : vector<8x32xf32> to vector<8x1x32xf32>
    %319 = vector.shape_cast %316 : vector<8x32xf32> to vector<1x8x32xf32>
    %320 = vector.broadcast %318 : vector<8x1x32xf32> to vector<8x8x32xf32>
    %321 = vector.broadcast %319 : vector<1x8x32xf32> to vector<8x8x32xf32>
    %322 = arith.addf %320, %321 : vector<8x8x32xf32>
    %cst_118 = arith.constant 0.000000e+00 : f32
    %323 = vector.broadcast %cst_118 : f32 to vector<8x8x32xf32>
    %324 = arith.maximumf %322, %323 : vector<8x8x32xf32>
    %325 = vector.shape_cast %313 : vector<1x32xf32> to vector<1x1x32xf32>
    %326 = vector.broadcast %325 : vector<1x1x32xf32> to vector<8x8x32xf32>
    %327 = arith.mulf %324, %326 : vector<8x8x32xf32>
    %cst_119 = arith.constant dense<0.000000e+00> : vector<8x8xf32>
    %328 = vector.multi_reduction <add>, %327, %cst_119 [2] : vector<8x8x32xf32> to vector<8x8xf32>
    %cst_120 = arith.constant -1.000000e+02 : f32
    %329 = vector.broadcast %cst_120 : f32 to vector<8x8xf32>
    %330 = arith.select %308, %328, %329 : vector<8x8xi1>, vector<8x8xf32>
    %cst_121 = arith.constant dense<0xFF800000> : vector<8xf32>
    %331 = vector.multi_reduction <maximumf>, %330, %cst_121 [1] : vector<8x8xf32> to vector<8xf32>
    %332 = vector.shape_cast %331 : vector<8xf32> to vector<8x1xf32>
    %333 = vector.broadcast %332 : vector<8x1xf32> to vector<8x8xf32>
    %334 = arith.subf %330, %333 : vector<8x8xf32>
    %335 = math.exp %334 : vector<8x8xf32>
    %cst_122 = arith.constant dense<0.000000e+00> : vector<8xf32>
    %336 = vector.multi_reduction <add>, %335, %cst_122 [1] : vector<8x8xf32> to vector<8xf32>
    %337 = vector.shape_cast %336 : vector<8xf32> to vector<8x1xf32>
    %338 = tpu.reciprocal %337 {approx = true} : vector<8x1xf32> -> vector<8x1xf32>
    %339 = vector.broadcast %338 : vector<8x1xf32> to vector<8x8xf32>
    %340 = arith.mulf %335, %339 : vector<8x8xf32>
    %cst_123 = arith.constant 0.000000e+00 : f32
    %341 = vector.broadcast %cst_123 : f32 to vector<8x8xf32>
    %342 = arith.select %311, %340, %341 : vector<8x8xi1>, vector<8x8xf32>
    %cst_124 = arith.constant dense<0.000000e+00> : vector<8x32xf32>
    %343 = tpu.matmul %342, %317, %cst_124 {dimension_numbers = #tpu.dot_dimension_numbers<[1], [0], [0], [1], [0, 0, 1, 1], [], []>} : vector<8x8xf32>, vector<8x32xf32>, vector<8x32xf32> -> vector<8x32xf32>
    %344 = arith.addf %304, %343 : vector<8x32xf32>
    %cst_125 = arith.constant 0.000000e+00 : f32
    %345 = vector.broadcast %cst_125 : f32 to vector<8x32xf32>
    %346 = arith.maximumf %344, %345 : vector<8x32xf32>
    %cst_126 = arith.constant dense<0.000000e+00> : vector<8x96xf32>
    %347 = tpu.matmul %346, %312, %cst_126 {dimension_numbers = #tpu.dot_dimension_numbers<[1], [0], [0], [1], [0, 0, 1, 1], [], []>} : vector<8x32xf32>, vector<32x96xf32>, vector<8x96xf32> -> vector<8x96xf32>
    %348 = vector.extract_strided_slice %347 {offsets = [0, 0], sizes = [8, 32], strides = [1, 1]} : vector<8x96xf32> to vector<8x32xf32>
    %349 = vector.extract_strided_slice %347 {offsets = [0, 32], sizes = [8, 32], strides = [1, 1]} : vector<8x96xf32> to vector<8x32xf32>
    %350 = vector.extract_strided_slice %347 {offsets = [0, 64], sizes = [8, 32], strides = [1, 1]} : vector<8x96xf32> to vector<8x32xf32>
    %351 = vector.shape_cast %348 : vector<8x32xf32> to vector<8x1x32xf32>
    %352 = vector.shape_cast %349 : vector<8x32xf32> to vector<1x8x32xf32>
    %353 = vector.broadcast %351 : vector<8x1x32xf32> to vector<8x8x32xf32>
    %354 = vector.broadcast %352 : vector<1x8x32xf32> to vector<8x8x32xf32>
    %355 = arith.addf %353, %354 : vector<8x8x32xf32>
    %cst_127 = arith.constant 0.000000e+00 : f32
    %356 = vector.broadcast %cst_127 : f32 to vector<8x8x32xf32>
    %357 = arith.maximumf %355, %356 : vector<8x8x32xf32>
    %358 = vector.shape_cast %313 : vector<1x32xf32> to vector<1x1x32xf32>
    %359 = vector.broadcast %358 : vector<1x1x32xf32> to vector<8x8x32xf32>
    %360 = arith.mulf %357, %359 : vector<8x8x32xf32>
    %cst_128 = arith.constant dense<0.000000e+00> : vector<8x8xf32>
    %361 = vector.multi_reduction <add>, %360, %cst_128 [2] : vector<8x8x32xf32> to vector<8x8xf32>
    %cst_129 = arith.constant -1.000000e+02 : f32
    %362 = vector.broadcast %cst_129 : f32 to vector<8x8xf32>
    %363 = arith.select %308, %361, %362 : vector<8x8xi1>, vector<8x8xf32>
    %cst_130 = arith.constant dense<0xFF800000> : vector<8xf32>
    %364 = vector.multi_reduction <maximumf>, %363, %cst_130 [1] : vector<8x8xf32> to vector<8xf32>
    %365 = vector.shape_cast %364 : vector<8xf32> to vector<8x1xf32>
    %366 = vector.broadcast %365 : vector<8x1xf32> to vector<8x8xf32>
    %367 = arith.subf %363, %366 : vector<8x8xf32>
    %368 = math.exp %367 : vector<8x8xf32>
    %cst_131 = arith.constant dense<0.000000e+00> : vector<8xf32>
    %369 = vector.multi_reduction <add>, %368, %cst_131 [1] : vector<8x8xf32> to vector<8xf32>
    %370 = vector.shape_cast %369 : vector<8xf32> to vector<8x1xf32>
    %371 = tpu.reciprocal %370 {approx = true} : vector<8x1xf32> -> vector<8x1xf32>
    %372 = vector.broadcast %371 : vector<8x1xf32> to vector<8x8xf32>
    %373 = arith.mulf %368, %372 : vector<8x8xf32>
    %cst_132 = arith.constant 0.000000e+00 : f32
    %374 = vector.broadcast %cst_132 : f32 to vector<8x8xf32>
    %375 = arith.select %311, %373, %374 : vector<8x8xi1>, vector<8x8xf32>
    %cst_133 = arith.constant dense<0.000000e+00> : vector<8x32xf32>
    %376 = tpu.matmul %375, %350, %cst_133 {dimension_numbers = #tpu.dot_dimension_numbers<[1], [0], [0], [1], [0, 0, 1, 1], [], []>} : vector<8x8xf32>, vector<8x32xf32>, vector<8x32xf32> -> vector<8x32xf32>
    %377 = arith.addf %346, %376 : vector<8x32xf32>
    %cst_134 = arith.constant 0.000000e+00 : f32
    %378 = vector.broadcast %cst_134 : f32 to vector<8x32xf32>
    %379 = arith.maximumf %377, %378 : vector<8x32xf32>
    %c0_135 = arith.constant 0 : index
    %c0_136 = arith.constant 0 : index
    %380 = vector.load %arg8[%c0_135, %c0_136] : memref<32x32xf32, #tpu.memory_space<vmem>>, vector<32x32xf32>
    %cst_137 = arith.constant dense<0.000000e+00> : vector<8x32xf32>
    %381 = tpu.matmul %379, %380, %cst_137 {dimension_numbers = #tpu.dot_dimension_numbers<[1], [0], [0], [1], [0, 0, 1, 1], [], []>} : vector<8x32xf32>, vector<32x32xf32>, vector<8x32xf32> -> vector<8x32xf32>
    %c0_138 = arith.constant 0 : index
    %c0_139 = arith.constant 0 : index
    %382 = vector.load %arg9[%c0_138, %c0_139] : memref<1x32xf32, #tpu.memory_space<vmem>>, vector<1x32xf32>
    %383 = vector.broadcast %382 : vector<1x32xf32> to vector<8x32xf32>
    %384 = arith.addf %381, %383 : vector<8x32xf32>
    %cst_140 = arith.constant 0.000000e+00 : f32
    %385 = vector.broadcast %cst_140 : f32 to vector<8x32xf32>
    %386 = arith.maximumf %384, %385 : vector<8x32xf32>
    %c0_141 = arith.constant 0 : index
    %c0_142 = arith.constant 0 : index
    %c0_143 = arith.constant 0 : index
    %387 = vector.load %arg10[%c0_141, %c0_142, %c0_143] : memref<1x8x32xf32, #tpu.memory_space<vmem>>, vector<1x8x32xf32>
    %388 = vector.shape_cast %387 : vector<1x8x32xf32> to vector<8x32xf32>
    %389 = vector.shape_cast %386 : vector<8x32xf32> to vector<1x8x32xf32>
    tpu.vector_store %arg10[%c0_141, %c0_142, %c0_143], %389 {strides = array<i32>} : memref<1x8x32xf32, #tpu.memory_space<vmem>>, vector<1x8x32xf32>,
    return
  }
  func.func @transform_0(%arg0: i32) -> (i32, i32, i32) {
    %c0_i32 = arith.constant 0 : i32
    %c0_i32_0 = arith.constant 0 : i32
    %c0_i32_1 = arith.constant 0 : i32
    return %arg0, %c0_i32, %c0_i32_0 : i32, i32, i32
  }
  func.func @transform_1(%arg0: i32) -> (i32, i32, i32) {
    %c0_i32 = arith.constant 0 : i32
    %c0_i32_0 = arith.constant 0 : i32
    %c0_i32_1 = arith.constant 0 : i32
    return %arg0, %c0_i32, %c0_i32_0 : i32, i32, i32
  }
  func.func @transform_2(%arg0: i32) -> (i32, i32) {
    %c0_i32 = arith.constant 0 : i32
    %c0_i32_0 = arith.constant 0 : i32
    %c0_i32_1 = arith.constant 0 : i32
    return %c0_i32, %c0_i32_0 : i32, i32
  }
  func.func @transform_3(%arg0: i32) -> (i32, i32) {
    %c0_i32 = arith.constant 0 : i32
    %c0_i32_0 = arith.constant 0 : i32
    %c0_i32_1 = arith.constant 0 : i32
    return %c0_i32, %c0_i32_0 : i32, i32
  }
  func.func @transform_4(%arg0: i32) -> (i32, i32) {
    %c0_i32 = arith.constant 0 : i32
    %c0_i32_0 = arith.constant 0 : i32
    %c0_i32_1 = arith.constant 0 : i32
    return %c0_i32, %c0_i32_0 : i32, i32
  }
  func.func @transform_5(%arg0: i32) -> (i32, i32) {
    %c0_i32 = arith.constant 0 : i32
    %c0_i32_0 = arith.constant 0 : i32
    %c0_i32_1 = arith.constant 0 : i32
    return %c0_i32, %c0_i32_0 : i32, i32
  }
  func.func @transform_6(%arg0: i32) -> (i32, i32) {
    %c0_i32 = arith.constant 0 : i32
    %c0_i32_0 = arith.constant 0 : i32
    %c0_i32_1 = arith.constant 0 : i32
    return %c0_i32, %c0_i32_0 : i32, i32
  }
  func.func @transform_7(%arg0: i32) -> (i32, i32) {
    %c0_i32 = arith.constant 0 : i32
    %c0_i32_0 = arith.constant 0 : i32
    %c0_i32_1 = arith.constant 0 : i32
    return %c0_i32, %c0_i32_0 : i32, i32
  }
  func.func @transform_8(%arg0: i32) -> (i32, i32) {
    %c0_i32 = arith.constant 0 : i32
    %c0_i32_0 = arith.constant 0 : i32
    %c0_i32_1 = arith.constant 0 : i32
    return %c0_i32, %c0_i32_0 : i32, i32
  }
  func.func @transform_9(%arg0: i32) -> (i32, i32, i32) {
    %c0_i32 = arith.constant 0 : i32
    %c0_i32_0 = arith.constant 0 : i32
    %c0_i32_1 = arith.constant 0 : i32
    return %arg0, %c0_i32, %c0_i32_0 : i32, i32, i32
  }
}

</mosaic_0001>

<bundles_post_ra>
// kernel: tpu_custom_call.1
= control target key start
LH: loop header
LB: loop body
LE: loop exit
PB: predicated region body
PF: predicated region fallthrough
CT: control target
= control target key end

     0   :  { %s3902_s0 = inlined_call_operand.hbm [shape: f32[2,8,16], index: 0, kind: input, shape index: {}]   ;;  %s3903_s1 = inlined_call_operand.hbm [shape: f32[2,8,8], index: 1, kind: input, shape index: {}]   ;;  %s3904_s2 = inlined_call_operand.hbm [shape: f32[16,128], index: 2, kind: input, shape index: {}]   ;;  %s3905_s3 = inlined_call_operand.hbm [shape: f32[32,128], index: 3, kind: input, shape index: {}]   ;;  %s3906_s4 = inlined_call_operand.vmem [shape: f32[1,128], index: 4, kind: input, shape index: {}]   ;;  %s3907_s5 = inlined_call_operand.hbm [shape: f32[32,96], index: 5, kind: input, shape index: {}]   ;;  %s3908_s6 = inlined_call_operand.vmem [shape: f32[1,32], index: 6, kind: input, shape index: {}]   ;;  %s3909_s7 = inlined_call_operand.hbm [shape: f32[32,32], index: 7, kind: input, shape index: {}]   ;;  %s3910_s8 = inlined_call_operand.vmem [shape: f32[1,32], index: 8, kind: input, shape index: {}]   ;;  %s3911_s9 = inlined_call_operand.hbm [shape: f32[2,8,32], index: 9, kind: output, shape index: {}]  }
   0x1   :  { %3917 = sst [smem:[#allocation24_spill]] %s3904_s2 }
   0x2   :  { %3918 = sst [smem:[#allocation25_spill]] %s3905_s3 }
   0x3   :  { %3919 = sst [smem:[#allocation26_spill]] %s3907_s5 }
   0x4   :  { %3920 = sst [smem:[#allocation27_spill]] %s3909_s7 }
   0x5   :  { %3921 = sst [smem:[#allocation28_spill]] %s3911_s9 }
   0x6   :  { %14 = vsyncpa [#allocation6], 0 }
   0x7   :  { %16 = vsyncpa [#allocation6 + $0x1], 0 }
   0x8   :  { %17 = vsyncpa [#allocation9], 0 }
   0x9   :  { %19 = vsyncpa [#allocation9 + $0x1], 0 }
   0xa   :  { %20 = vsyncpa [#allocation12], 0 }
   0xb   :  { %21 = vsyncpa [#allocation15], 0 }
   0xc   :  { %22 = vsyncpa [#allocation7], 0 }
   0xd   :  { %24 = vsyncpa [#allocation7 + $0x1], 0  ;;  %s3202_s30 = smov 0   ;;  %s3204_s10 = smov 0  }
   0xe   :  { %s3206_s11 = smov 0   ;;  %s3208_s12 = smov 0  }
   0xf LB: > { %s3135_s13 = smov [#allocation10]   ;;  %s3223_s15 = sadd.s32 4294967295, %s3133_s12   ;;  %s3133_s12 = sphi %s3208_s12, %s3956_s12   ;;  %s3129_s11 = sphi %s3206_s11, %s3955_s11   ;;  %s3125_s10 = sphi %s3204_s10, %s3954_s10   ;;  %s3121_s30 = sphi %s3202_s30, %s3953_s30  }
  0x10   : > { %s272_s14 = sshll.u32 %s3135_s13, 4  ;;  %p2390_p0 = scmp.ge.s32.totalorder %s3133_s12, 1  ;;  %s3228_s14 = int_to_ptr.vmem [resolvable:$true] %s272_s14 }
  0x11   : > { %p3913_p1 = scmp.eq.s32.totalorder %s3223_s15, 0  ;;  %p260_p2 = scmp.lt.s32.totalorder %s3133_s12, 3 }
  0x12   : > { %s3136_s17 = smov [#allocation11]   ;;  %s3137_s20 = smov [#allocation13]  }
  0x13   : > { %p3230_p3 = pnand %p2390_p0, %p260_p2  ;;  %s285_s18 = sshll.u32 %s3136_s17, 4  ;;  %s3243_s18 = int_to_ptr.vmem [resolvable:$true] %s285_s18 }
  0x14   : > { %s301_s21 = sshll.u32 %s3137_s20, 4  ;;  %s3924_s2 = sld [smem:[#allocation24_spill]]  ;;  %s3245_s21 = int_to_ptr.vmem [resolvable:$true] %s301_s21 }
  0x15   : > { %s3922_s16 = scalar_select %p3230_p3, 1, 0 }
  0x16   : > { %p2727_p5 = pneg %p3230_p3 }
  0x18   : > { %p3239_p6 = pnand %p2727_p5, %p3913_p1 }
  0x1a   : > { %s2879_s24 = scalar_lea.hbm %s3924_s2, 256  ;;  %p3255_p8 = pneg %p3239_p6 }
  0x1b   : > { %p2880_p7 = scmp.ne.s32.totalorder %s3924_s2, %s2879_s24  ;;  %p2886_p11 = scmp.lt.u32.totalorder %s2879_s24, %s3924_s2 }
  0x1d   : > { %p2882_p9 = pnand %p3255_p8, %p2880_p7 }
  0x1f   : > { %p2883_p10 = pneg %p2882_p9 }
  0x21   : > { %p2888_p12 = pnand %p2886_p11, %p2883_p10 }
  0x23   : > { %2891 = shalt.err (!%p2888_p12)
}
  0x24   : > { %s2892_s13 = scalar_lea.vmem %s3228_s14, 256  ;;  %p2900_p5 = scmp.lt.s32.totalorder %s3228_s14, %s3228_s14 }
  0x25   : > { %p2893_p13 = scmp.ne.s32.totalorder %s3228_s14, %s2892_s13  ;;  %p2901_p4 = scmp.lt.s32.totalorder %s2892_s13, %s2892_s13 }
  0x27   : > { %p2895_p0 = pnand %p2893_p13, %p3255_p8  ;;  %p2902_p7 = por %p2901_p4, %p2900_p5 }
  0x29   : > { %p2896_p2 = pneg %p2895_p0 }
  0x2b   : > { %p2903_p9 = pnand %p2902_p7, %p2896_p2 }
  0x2d   : > { %2906 = shalt.err (!%p2903_p9)
}
  0x2e   : > { %s3138_s17 = smov 128   ;;  %s3139_s20 = smov 8  }
  0x2f   : > { %2730 = dma.hbm_to_vmem [thread:$0]  (!%p3239_p6), %s3924_s2, 256, %s3228_s14, [#allocation9], %s3138_s17, %s3138_s17, %s3139_s20  }
  0x30   : > { %s3926_s3 = sld [smem:[#allocation25_spill]] }
  0x36   : > { %s2907_s26 = scalar_lea.hbm %s3926_s3, 512 }
  0x37   : > { %p2908_p4 = scmp.ne.s32.totalorder %s3926_s3, %s2907_s26  ;;  %p2914_p12 = scmp.lt.u32.totalorder %s2907_s26, %s3926_s3 }
  0x39   : > { %p2910_p10 = pnand %p2908_p4, %p3255_p8 }
  0x3b   : > { %p2911_p11 = pneg %p2910_p10 }
  0x3d   : > { %p2916_p13 = pnand %p2914_p12, %p2911_p11 }
  0x3f   : > { %2919 = shalt.err (!%p2916_p13)
}
  0x40   : > { %s2920_s14 = scalar_lea.vmem %s3243_s18, 512  ;;  %p2928_p7 = scmp.lt.s32.totalorder %s3243_s18, %s3243_s18 }
  0x41   : > { %p2921_p0 = scmp.ne.s32.totalorder %s3243_s18, %s2920_s14  ;;  %p2929_p9 = scmp.lt.s32.totalorder %s2920_s14, %s2920_s14 }
  0x43   : > { %p2923_p2 = pnand %p2921_p0, %p3255_p8  ;;  %p2930_p4 = por %p2929_p9, %p2928_p7 }
  0x45   : > { %p2924_p5 = pneg %p2923_p2 }
  0x47   : > { %p2931_p10 = pnand %p2930_p4, %p2924_p5 }
  0x49   : > { %2934 = shalt.err (!%p2931_p10)
}
  0x4a   : > { %2733 = dma.hbm_to_vmem [thread:$0]  (!%p3239_p6), %s3926_s3, 512, %s3243_s18, [#allocation12], %s3138_s17, %s3138_s17, %s3139_s20  }
  0x4b   : > { %s3927_s5 = sld [smem:[#allocation26_spill]] }
  0x51   : > { %s2935_s25 = scalar_lea.hbm %s3927_s5, 512 }
  0x52   : > { %p2936_p11 = scmp.ne.s32.totalorder %s3927_s5, %s2935_s25  ;;  %p2942_p0 = scmp.lt.u32.totalorder %s2935_s25, %s3927_s5 }
  0x54   : > { %p2938_p12 = pnand %p2936_p11, %p3255_p8 }
  0x56   : > { %p2939_p13 = pneg %p2938_p12 }
  0x58   : > { %p2944_p2 = pnand %p2942_p0, %p2939_p13 }
  0x5a   : > { %2947 = shalt.err (!%p2944_p2)
}
  0x5b   : > { %s2948_s18 = scalar_lea.vmem %s3245_s21, 512  ;;  %p2956_p4 = scmp.lt.s32.totalorder %s3245_s21, %s3245_s21 }
  0x5c   : > { %p2949_p5 = scmp.ne.s32.totalorder %s3245_s21, %s2948_s18  ;;  %p2957_p10 = scmp.lt.s32.totalorder %s2948_s18, %s2948_s18 }
  0x5e   : > { %p2951_p7 = pnand %p2949_p5, %p3255_p8  ;;  %p2958_p11 = por %p2957_p10, %p2956_p4 }
  0x60   : > { %p2952_p9 = pneg %p2951_p7 }
  0x62   : > { %p2959_p12 = pnand %p2958_p11, %p2952_p9 }
  0x64   : > { %2962 = shalt.err (!%p2959_p12)
}
  0x65   : > { %2736 = dma.hbm_to_vmem [thread:$0]  (!%p3239_p6), %s3927_s5, 512, %s3245_s21, [#allocation12], %s3138_s17, %s3138_s17, %s3139_s20  }
  0x66   : > { %s3140_s22 = smov [#allocation14]   ;;  %s3928_s7 = sld [smem:[#allocation27_spill]] }
  0x67   : > { %s317_s23 = sshll.u32 %s3140_s22, 4  ;;  %s318_s23 = int_to_ptr.vmem [resolvable:$true] %s317_s23 }
  0x6c   : > { %s2963_s26 = scalar_lea.hbm %s3928_s7, 512 }
  0x6d   : > { %p2964_p13 = scmp.ne.s32.totalorder %s3928_s7, %s2963_s26  ;;  %p2970_p5 = scmp.lt.u32.totalorder %s2963_s26, %s3928_s7 }
  0x6f   : > { %p2966_p0 = pnand %p2964_p13, %p3255_p8 }
  0x71   : > { %p2967_p2 = pneg %p2966_p0 }
  0x73   : > { %p2972_p7 = pnand %p2970_p5, %p2967_p2 }
  0x75   : > { %2975 = shalt.err (!%p2972_p7)
}
  0x76   : > { %s2976_s21 = scalar_lea.vmem %s318_s23, 512  ;;  %p2984_p11 = scmp.lt.s32.totalorder %s318_s23, %s318_s23 }
  0x77   : > { %p2977_p9 = scmp.ne.s32.totalorder %s318_s23, %s2976_s21  ;;  %p2985_p12 = scmp.lt.s32.totalorder %s2976_s21, %s2976_s21 }
  0x79   : > { %p2979_p4 = pnand %p2977_p9, %p3255_p8  ;;  %p2986_p1 = por %p2985_p12, %p2984_p11 }
  0x7b   : > { %p2980_p10 = pneg %p2979_p4 }
  0x7d   : > { %p2987_p3 = pnand %p2986_p1, %p2980_p10 }
  0x7f   : > { %2990 = shalt.err (!%p2987_p3)
}
  0x80   : > { %2739 = dma.hbm_to_vmem [thread:$0]  (!%p3239_p6), %s3928_s7, 512, %s318_s23, [#allocation15], %s3138_s17, %s3138_s17, %s3139_s20  }
  0x81   : > { %s2389_s19 = sadd.s32 4294967294, %s3133_s12   ;;  %s3354_s27 = sadd.s32 1, %s3133_s12  }
  0x82   : > { %s34_s22 = ssub.s32 %s3133_s12, %s3354_s27  ;;  %s37_s24 = sadd.s32 1, %s3129_s11 }
  0x83   : > { %p35_p1 = scmp.eq.s32.totalorder %s34_s22, 0  ;;  %p44_p3 = scmp.ne.s32.totalorder %s3129_s11, %s3125_s10 }
  0x84   : > { %p45_p8 = scmp.eq.s32.totalorder %s3133_s12, 0  ;;  %p50_p13 = scmp.ne.s32.totalorder %s3125_s10, %s3121_s30 }
  0x85   : > { %s3365_s25 = scalar_select %p35_p1, %s3129_s11, %s37_s24  }
  0x86   : > { %p3367_p0 = por %p45_p8, %p44_p3  ;;  %p3931_p2 = scmp.eq.s32.totalorder %s3223_s15, 0 }
  0x87   : > { %3929 = sst [smem:[#allocation23_spill]] %s3365_s25  ;;  %p247_p5 = scmp.eq.s32.totalorder %s3223_s15, 1 }
  0x88   : > { %p3373_p6 = por %p3931_p2, %p50_p13  ;;  %p253_p7 = scmp.eq.s32.totalorder %s2389_s19, 1 }
  0x89   : > { %p2755_p9 = scmp.lt.s32.totalorder %s3133_s12, 2  ;;  %s334_s20 = sand.u32 1, %s3129_s11  }
  0x8a   : > { %s3932_s17 = scalar_select %p3373_p6, 1, 0 }
  0x8b   : > { %p3380_p4 = por %p247_p5, %p44_p3  ;;  %p3384_p10 = por %p253_p7, %p50_p13 }
  0x8c   : > { %s3388_s29 = sshll.u32 %s334_s20, 3  ;;  %s2397_s13 = sshll.u32 %s3133_s12, 7 }
  0x8d   : > { %s3933_s23 = scalar_select %p3380_p4, 1, 0 }
  0x8e   : > { %s3934_s28 = scalar_select %p3384_p10, 1, 0 }
  0x8f   : > { %s3394_s14 = scalar_lea.hbm %s3902_s0, %s2397_s13  ;;  %s338_s9 = scalar_lea.vmem [#allocation5], %s3388_s29 }
  0x90   : > { %s345_s19 = sshll.u32 %s338_s9, 4  ;;  %p3401_p11 = pnand %p2755_p9, %p3367_p0  ;;  %s3397_s19 = int_to_ptr.vmem [resolvable:$true] %s345_s19 }
  0x91   : > { %s3408_s18 = scalar_lea.hbm %s3903_s1, %s2397_s13  ;;  %s352_s21 = sand.u32 1, %s3133_s12  }
  0x92   : > { %s335_s3 = scalar_lea.sflag [#allocation6], %s334_s20  ;;  %s2991_s5 = scalar_lea.hbm %s3394_s14, 128 }
  0x93   : > { %p2992_p12 = scmp.ne.s32.totalorder %s3394_s14, %s2991_s5  ;;  %p2993_p1 = pneg %p3401_p11 }
  0x94   : > { %s2996_s7 = scalar_lea.hbm %s3902_s0, 256  ;;  %p2997_p13 = scmp.lt.u32.totalorder %s3394_s14, %s3902_s0 }
  0x95   : > { %p2994_p3 = pnand %p2993_p1, %p2992_p12  ;;  %p2998_p0 = scmp.lt.u32.totalorder %s2996_s7, %s2991_s5 }
  0x96   : > { %p3000_p5 = scmp.lt.u32.totalorder %s2991_s5, %s3394_s14 }
  0x97   : > { %p2995_p8 = pneg %p2994_p3  ;;  %p2999_p2 = por %p2998_p0, %p2997_p13 }
  0x99   : > { %p3001_p7 = por %p3000_p5, %p2999_p2 }
  0x9b   : > { %p3002_p9 = pnand %p3001_p7, %p2995_p8 }
  0x9d   : > { %3005 = shalt.err (!%p3002_p9)
}
  0x9e   : > { %s3006_s20 = scalar_lea.vmem %s3397_s19, 128  ;;  %s3141_s13 = smov [#allocation5]  }
  0x9f   : > { %p3007_p12 = scmp.ne.s32.totalorder %s3397_s19, %s3006_s20  ;;  %s3011_s24 = sshll.u32 %s3141_s13, 4  ;;  %s3012_s24 = int_to_ptr.vmem [resolvable:$false] %s3011_s24 }
  0xa0   : > { %s3013_s25 = scalar_lea.vmem %s3012_s24, 256  ;;  %p3014_p4 = scmp.lt.s32.totalorder %s3397_s19, %s3012_s24 }
  0xa1   : > { %p3009_p3 = pnand %p3007_p12, %p2993_p1  ;;  %p3015_p13 = scmp.lt.s32.totalorder %s3013_s25, %s3006_s20 }
  0xa3   : > { %p3010_p10 = pneg %p3009_p3  ;;  %p3016_p0 = por %p3015_p13, %p3014_p4 }
  0xa5   : > { %p3017_p2 = pnand %p3016_p0, %p3010_p10 }
  0xa7   : > { %3020 = shalt.err (!%p3017_p2)
}
  0xa8   : > { %2743 = dma.hbm_to_vmem [thread:$0]  (!%p3401_p11), %s3394_s14, 128, %s3397_s19, %s335_s3  }
  0xa9   : > { %s356_s5 = scalar_lea.vmem [#allocation8], %s3388_s29  ;;  %s353_s26 = scalar_lea.sflag [#allocation9], %s352_s21 }
  0xaa   : > { %s363_s7 = sshll.u32 %s356_s5, 4  ;;  %s3021_s9 = scalar_lea.hbm %s3408_s18, 128  ;;  %s364_s7 = int_to_ptr.vmem [resolvable:$true] %s363_s7 }
  0xab   : > { %p3022_p4 = scmp.ne.s32.totalorder %s3408_s18, %s3021_s9  ;;  %s3026_s13 = scalar_lea.hbm %s3903_s1, 256 }
  0xac   : > { %p3027_p5 = scmp.lt.u32.totalorder %s3408_s18, %s3903_s1  ;;  %p3028_p7 = scmp.lt.u32.totalorder %s3026_s13, %s3021_s9 }
  0xad   : > { %p3024_p10 = pnand %p3022_p4, %p2993_p1  ;;  %p3030_p12 = scmp.lt.u32.totalorder %s3021_s9, %s3408_s18 }
  0xae   : > { %p3029_p9 = por %p3028_p7, %p3027_p5 }
  0xaf   : > { %p3025_p8 = pneg %p3024_p10 }
  0xb0   : > { %p3031_p3 = por %p3030_p12, %p3029_p9 }
  0xb2   : > { %p3032_p13 = pnand %p3031_p3, %p3025_p8 }
  0xb4   : > { %3035 = shalt.err (!%p3032_p13)
}
  0xb5   : > { %s3036_s3 = scalar_lea.vmem %s364_s7, 128  ;;  %s3142_s29 = smov [#allocation8]  }
  0xb6   : > { %p3037_p0 = scmp.ne.s32.totalorder %s364_s7, %s3036_s3  ;;  %s3041_s14 = sshll.u32 %s3142_s29, 4  ;;  %s3042_s14 = int_to_ptr.vmem [resolvable:$false] %s3041_s14 }
  0xb7   : > { %s3043_s19 = scalar_lea.vmem %s3042_s14, 256  ;;  %p3044_p10 = scmp.lt.s32.totalorder %s364_s7, %s3042_s14 }
  0xb8   : > { %p3039_p2 = pnand %p3037_p0, %p2993_p1  ;;  %p3045_p6 = scmp.lt.s32.totalorder %s3043_s19, %s3036_s3 }
  0xba   : > { %p3040_p4 = pneg %p3039_p2  ;;  %p3046_p5 = por %p3045_p6, %p3044_p10 }
  0xbc   : > { %p3047_p7 = pnand %p3046_p5, %p3040_p4 }
  0xbe   : > { %3050 = shalt.err (!%p3047_p7)
}
  0xbf   : > { %2746 = dma.hbm_to_vmem [thread:$0]  (!%p3401_p11), %s3408_s18, 128, %s364_s7, %s353_s26  }
  0xc0   : > { %p3936_p8 = scmp.ne.s32.totalorder %s3922_s16, 0 }
  0xc1   : > { %s3461_s21 = sand.u32 (!%p3936_p8), 1, %s3125_s10   ;;  %p3937_p6 = scmp.ne.s32.totalorder (!%p3936_p8), %s3932_s17, 0 }
  0xc2   : > { %372 = sbr.rel (%p3936_p8) target bundleno = 8254 (0x203e), region = 56  ;;  %s3464_s5 = sshll.u32 (!%p3936_p8), %s3461_s21, 3 }
  0xc3   : > { %s375_s9 = scalar_lea.sflag (!%p3936_p8), [#allocation6], %s3461_s21  ;;  %s378_s2 = scalar_lea.vmem (!%p3936_p8), [#allocation5], %s3464_s5 }
  0xc9   : > { %3096 = dma.done.wait (%p3937_p6), %s375_s9, 128  }
  0xca   : > { %3098 = vsyncadd (%p3937_p6), %s375_s9, 4294967168  ;;  %s383_s16 = sand.u32 1, %s3223_s15   ;;  %s387_s18 = scalar_lea.vmem [#allocation8], %s3464_s5 }
  0xcb   : > { %s384_s22 = scalar_lea.sflag [#allocation9], %s383_s16 }
  0xcc   : > { %3100 = dma.done.wait (%p3937_p6), %s384_s22, 128  }
  0xcd   : > { %3102 = vsyncadd (%p3937_p6), %s384_s22, 4294967168  ;;  %p3938_p11 = scmp.eq.s32.totalorder %s3223_s15, 0 }
  0xcf   : > { %3104 = dma.done.wait (%p3938_p11), [#allocation9], 256   ;;  %p3939_p1 = pmov %p3938_p11 }
  0xd1   : > { %3106 = vsyncadd (%p3939_p1), [#allocation9], 4294967040  ;;  %p3940_p9 = pmov %p3939_p1 }
  0xd2   : > { %p3941_p12 = pmov %p3939_p1 }
  0xd3   : > { %3108 = dma.done.wait (%p3940_p9), [#allocation12], 1024  }
  0xd4   : > { %3110 = vsyncadd (%p3941_p12), [#allocation12], 4294966272  ;;  %p3942_p3 = pmov %p3939_p1 }
  0xd5   : > { %p3943_p13 = pmov %p3939_p1 }
  0xd6   : > { %3112 = dma.done.wait (%p3942_p3), [#allocation15], 512  }
  0xd7   : > { %3114 = vsyncadd (%p3943_p13), [#allocation15], 4294966784  ;;  %v3143_v0 = vmov 0.0|0.0   ;;  %vm3144_vm0 = vmmov 0   ;;  %v3145_v1 = vmov 0.0   ;;  %v444_v2 = vld [vmem:[#allocation10] sm:$0xff]  ;;  %v532_v12 = vlaneseq }
  0xd8   : > { %2636 = vmatprep.subr.bf16.mxu0 %v3143_v0  ;;  %2502 = vmatprep.mubr.msk.f32.mxu0 %vm3144_vm0, %v3145_v1  ;;  %v445_v3 = vld [vmem:[#allocation10 + $0x8] sm:$0xff]  ;;  %v528_v5 = vld [vmem:[#allocation11] sm:$0xff]  ;;  %v529_v6 = vld [vmem:[#allocation11 + $0x8] sm:$0xff]  ;;  %vm453_vm1 = vcmask 130048   ;;  %s3146_s26 = smov 64   ;;  %s3147_s20 = smov 32  }
  0xd9   : > { %2639 = vmatprep.subr.bf16.mxu1 %v3143_v0  ;;  %2513 = vmatprep.mubr.msk.f32.mxu1 %vm3144_vm0, %v3145_v1  ;;  %v2637_v4 = vpack.c.bf16 %v445_v3, %v444_v2  ;;  %v530_v7 = vld [vmem:[#allocation11 + $0x10] sm:$0xff]  ;;  %v3496_v8 = vpack.c.bf16 %v529_v6, %v528_v5  ;;  %v531_v9 = vld [vmem:[#allocation11 + $0x18] sm:$0xff]  ;;  %v533_v13 = vand.u32 127, %v532_v12  ;;  %v3519_v14 = vshrl.u32 %v532_v12, 7  ;;  %s3148_s13 = smov 16   ;;  %s3149_s24 = smov 96  }
  0xda   : > { %v443_v10 = vld [vmem:[%s378_s2] sm:$0xff]  ;;  %v3499_v11 = vpack.c.bf16 %v531_v9, %v530_v7  ;;  %vm653_vm3 = vcmask 122880   ;;  %vm550_vm4 = vcmask 261120   ;;  %vm1698_vm5 = vcmask 1041409   ;;  %s2433_s19 = sshll.u32 %s3223_s15, 7  ;;  %s442_s9 = scalar_lea.vmem [#allocation16], %s3464_s5 }
  0xdb   : > { %2638 = vmatpush3.bf16.msra.mxu0 %v2637_v4  ;;  %2641 = vmatpush3.bf16.msra.mxu1 %v3496_v8  ;;  %v3522_v15 = vsub.s32 %v533_v13, %v3519_v14  ;;  %v2408_v16 = vld [vmem:[%s3906_s4] ss:$0 sm:$0xff]  ;;  %v538_v20 = vand.u32 31, %v533_v13  ;;  %vm1700_vm6 = vcmask 1042434   ;;  %vm1702_vm7 = vcmask 1043459   ;;  %s2258_s2 = sshll.u32 %s442_s9, 4  ;;  %s3859_s2 = int_to_ptr.vmem [resolvable:$true] %s2258_s2 }
  0xdc   : > { %2645 = vmatprep.subr.bf16.mxu0 %v3143_v0  ;;  %2642 = vmatprep.subr.bf16.mxu1 %v3143_v0  ;;  %vm1704_vm8 = vcmask 1044484   ;;  %vm1706_vm9 = vcmask 1045509   ;;  %vm1708_vm10 = vcmask 1046534   ;;  %vm1710_vm11 = vcmask 1047559   ;;  %s2245_s7 = scalar_lea.sflag [#allocation7], %s3461_s21  ;;  %p3949_p2 = scmp.ne.s32.totalorder %s3933_s23, 0 }
  0xdd   : > { %vm3527_vm2 = vcmp.lt.s32.totalorder %v538_v20, 16  ;;  %vm1714_vm13 = vcmask 64512   ;;  %s3151_s15 = smov [#allocation16]  }
  0xde   : > { %2503 = vmatmul.mubr.msk.f32.vlgmr.msra.gmra.mrb[0].mxu0 %vm453_vm1, %v443_v10  ;;  %s3055_s5 = sshll.u32 %s3151_s15, 4  ;;  %s3056_s5 = int_to_ptr.vmem [resolvable:$false] %s3055_s5 }
  0xdf   : > { %2647 = vmatpush3.bf16.msra.mxu0 %v3496_v8  ;;  %2524 = vmatprep.mubr.msk.f32.mxu0 %vm3144_vm0, %v3145_v1  ;;  %p3058_p5 = scmp.lt.s32.totalorder %s3859_s2, %s3056_s5 }
  0xe0   : > { %2644 = vmatpush3.bf16.msra.mxu1 %v3499_v11  ;;  %2648 = vmatprep.subr.bf16.mxu0 %v3143_v0 }
  0xe1   : > { %2651 = vmatprep.subr.bf16.mxu1 %v3143_v0 }
  0xe3   : > { %2514 = vmatmul.mubr.f32.vlgmr.msra.gmra.mrb[0].mxu1 %v3145_v1  ;;  %2650 = vmatpush3.bf16.msra.mxu0 %v3499_v11 }
  0xe4   : > { %2653 = vmatpush3.bf16.msra.mxu1 %v3496_v8  ;;  %2535 = vmatprep.mubr.msk.f32.mxu1 %vm3144_vm0, %v3145_v1 }
  0xe5   : > { %2654 = vmatprep.subr.bf16.mxu1 %v3143_v0  ;;  %2657 = vmatprep.subr.bf16.mxu0 %v3143_v0 }
  0xe8   : > { %2656 = vmatpush3.bf16.msra.mxu1 %v3499_v11 }
  0xe9   : > { %2663 = vmatprep.subr.bf16.mxu1 %v3143_v0 }
 0x1b1   : > { %v523_v17 = vpop.f32.mrb[0].mxu0 }
 0x1b2   : > { %v524_v18 = vadd.f32 %v2408_v16, %v523_v17  ;;  %v2504_v19 = vpop.f32.mrb[1].mxu0 }
 0x1b4   : > { %527 = vst [vmem:[#allocation2] sm:$0xff] %v524_v18 }
 0x1b6   : > { %v620_v21 = vpop.f32.mrb[0].mxu1 }
 0x1b7   : > { %v2515_v22 = vpop.f32.mrb[1].mxu1 }
 0x1bb   : > { %v547_v24 = vld [vmem:[#allocation2] sm:$0x1]  ;;  %v548_v25 = vld [vmem:[#allocation2 + $0x7] sm:$0x1]  ;;  %v659_v42 = vld [vmem:[#allocation2 + $0x1] sm:$0x1] }
 0x1bc   : > { %v549_v26 = vsel %vm3527_vm2, %v547_v24, %v548_v25  ;;  %v660_v43 = vld [vmem:[#allocation2 + $0x6] sm:$0x1]  ;;  %v768_v62 = vld [vmem:[#allocation2 + $0x2] sm:$0x1]  ;;  %v769_v63 = vld [vmem:[#allocation2 + $0x5] sm:$0x1] }
 0x1bd   : > { %v624_v27 = vadd.f32 %v620_v21, %v549_v26  ;;  %v661_v44 = vsel %vm3527_vm2, %v659_v42, %v660_v43  ;;  %v770_v2 = vsel %vm3527_vm2, %v768_v62, %v769_v63  ;;  %v877_v25 = vld [vmem:[#allocation2 + $0x3] sm:$0x1]  ;;  %v878_v26 = vld [vmem:[#allocation2 + $0x4] sm:$0x1] }
 0x1bf   : > { %2807 = vtanh.f32 %v624_v27  ;;  %v2410_v29 = vmul.f32 -1.442695, %v624_v27  ;;  %v879_v27 = vsel %vm3527_vm2, %v877_v25, %v878_v26 }
 0x1c1   : > { %2809 = vpow2.f32 %v2410_v29 }
 0x1c9   : > { %v2808_v28 = vpop.eup %2807 }
 0x1ca   : > { %634 = vrot.lane.b32.xlu0 %v2808_v28, %s3146_s26 }
 0x1cb   : > { %v2810_v30 = vpop.eup %2809 }
 0x1cc   : > { %v628_v31 = vadd.f32 1.0, %v2810_v30 }
 0x1ce   : > { %2811 = vrcp.f32 %v628_v31 }
 0x1d8   : > { %v2812_v32 = vpop.eup %2811 }
 0x1d9   : > { %v632_v35 = vmul.f32 0.0, %v2812_v32 }
 0x23c   : > { %v635_v33 = vpop.permute.xlu0 %634 }
 0x23d   : > { %v637_v34 = vmul.f32 %v2812_v32, %v635_v33 }
 0x23f   : > { %639 = vrot.lane.b32.xlu0 %v637_v34, %s3147_s20 }
 0x2b1   : > { %v640_v36 = vpop.permute.xlu0 %639 }
 0x2b2   : > { %v642_v37 = vadd.f32 %v640_v36, %v632_v35 }
 0x2b4   : > { %2813 = vtanh.f32 %v642_v37 }
 0x2be   : > { %v2814_v38 = vpop.eup %2813 }
 0x2bf   : > { %645 = vrot.lane.b32.xlu1 %v2814_v38, %s3146_s26 }
 0x331   : > { %v646_v39 = vpop.permute.xlu1 %645 }
 0x332   : > { %v3536_v40 = vmul.f32 %v2812_v32, %v646_v39 }
 0x334   : > { %650 = vrot.lane.b32.xlu1 %v3536_v40, %s3147_s20 }
 0x3a6   : > { %v651_v41 = vpop.permute.xlu1 %650 }
 0x3a7   : > { %654 = vst.msk [vmem:[#allocation3] sm:$0x1] %vm653_vm3, %v651_v41  ;;  %2525 = vmatmul.mubr.msk.f32.vlgmr.msra.gmra.mrb[2].mxu0 %vm550_vm4, %v651_v41 }
 0x3a8   : > { %2659 = vmatpush3.bf16.msra.mxu0 %v3496_v8  ;;  %2546 = vmatprep.mubr.msk.f32.mxu0 %vm3144_vm0, %v3145_v1 }
 0x3a9   : > { %2660 = vmatprep.subr.bf16.mxu0 %v3143_v0 }
 0x3ac   : > { %2662 = vmatpush3.bf16.msra.mxu0 %v3499_v11 }
 0x3ad   : > { %2669 = vmatprep.subr.bf16.mxu0 %v3143_v0 }
 0x47a   : > { %v730_v45 = vpop.f32.mrb[2].mxu0 }
 0x47b   : > { %v734_v46 = vadd.f32 %v730_v45, %v661_v44  ;;  %v2526_v47 = vpop.f32.mrb[3].mxu0 }
 0x47c   : > { %v987_v47 = vld [vmem:[#allocation2 + $0x3] sm:$0x1] }
 0x47d   : > { %2815 = vtanh.f32 %v734_v46  ;;  %v2412_v49 = vmul.f32 -1.442695, %v734_v46  ;;  %v986_v46 = vld [vmem:[#allocation2 + $0x4] sm:$0x1] }
 0x47f   : > { %2817 = vpow2.f32 %v2412_v49 }
 0x487   : > { %v2816_v48 = vpop.eup %2815 }
 0x488   : > { %744 = vrot.lane.b32.xlu0 %v2816_v48, %s3146_s26  ;;  %v988_v48 = vsel %vm3527_vm2, %v986_v46, %v987_v47 }
 0x489   : > { %v2818_v50 = vpop.eup %2817 }
 0x48a   : > { %v738_v51 = vadd.f32 1.0, %v2818_v50 }
 0x48c   : > { %2819 = vrcp.f32 %v738_v51 }
 0x496   : > { %v2820_v52 = vpop.eup %2819 }
 0x497   : > { %v742_v55 = vmul.f32 %v2820_v52, %v642_v37 }
 0x4fa   : > { %v745_v53 = vpop.permute.xlu0 %744 }
 0x4fb   : > { %v747_v54 = vmul.f32 %v2820_v52, %v745_v53 }
 0x4fd   : > { %749 = vrot.lane.b32.xlu1 %v747_v54, %s3147_s20 }
 0x56f   : > { %v750_v56 = vpop.permute.xlu1 %749 }
 0x570   : > { %v752_v57 = vadd.f32 %v750_v56, %v742_v55 }
 0x572   : > { %2821 = vtanh.f32 %v752_v57 }
 0x57c   : > { %v2822_v58 = vpop.eup %2821 }
 0x57d   : > { %755 = vrot.lane.b32.xlu0 %v2822_v58, %s3146_s26 }
 0x5ef   : > { %v756_v59 = vpop.permute.xlu0 %755 }
 0x5f0   : > { %v3553_v60 = vmul.f32 %v2820_v52, %v756_v59 }
 0x5f2   : > { %760 = vrot.lane.b32.xlu1 %v3553_v60, %s3147_s20 }
 0x664   : > { %v761_v61 = vpop.permute.xlu1 %760 }
 0x665   : > { %763 = vst.msk [vmem:[#allocation3 + $0x1] sm:$0x1] %vm653_vm3, %v761_v61  ;;  %2536 = vmatmul.mubr.msk.f32.vlgmr.msra.gmra.mrb[2].mxu1 %vm550_vm4, %v761_v61 }
 0x666   : > { %2665 = vmatpush3.bf16.msra.mxu1 %v3496_v8  ;;  %2557 = vmatprep.mubr.msk.f32.mxu1 %vm3144_vm0, %v3145_v1 }
 0x667   : > { %2666 = vmatprep.subr.bf16.mxu1 %v3143_v0 }
 0x66a   : > { %2668 = vmatpush3.bf16.msra.mxu1 %v3499_v11 }
 0x66b   : > { %2675 = vmatprep.subr.bf16.mxu1 %v3143_v0 }
 0x738   : > { %v839_v3 = vpop.f32.mrb[2].mxu1 }
 0x739   : > { %v843_v4 = vadd.f32 %v839_v3, %v770_v2  ;;  %v2537_v5 = vpop.f32.mrb[3].mxu1 }
 0x73a   : > { %v1095_v5 = vld [vmem:[#allocation2 + $0x5] sm:$0x1] }
 0x73b   : > { %2823 = vtanh.f32 %v843_v4  ;;  %v2414_v7 = vmul.f32 -1.442695, %v843_v4 }
 0x73d   : > { %2825 = vpow2.f32 %v2414_v7 }
 0x745   : > { %v2824_v6 = vpop.eup %2823 }
 0x746   : > { %853 = vrot.lane.b32.xlu0 %v2824_v6, %s3146_s26  ;;  %v1096_v6 = vld [vmem:[#allocation2 + $0x2] sm:$0x1] }
 0x747   : > { %v2826_v9 = vpop.eup %2825  ;;  %v1097_v7 = vsel %vm3527_vm2, %v1095_v5, %v1096_v6 }
 0x748   : > { %v847_v10 = vadd.f32 1.0, %v2826_v9 }
 0x74a   : > { %2827 = vrcp.f32 %v847_v10 }
 0x754   : > { %v2828_v12 = vpop.eup %2827 }
 0x755   : > { %v851_v17 = vmul.f32 %v2828_v12, %v752_v57 }
 0x7b8   : > { %v854_v13 = vpop.permute.xlu0 %853 }
 0x7b9   : > { %v856_v16 = vmul.f32 %v2828_v12, %v854_v13 }
 0x7bb   : > { %858 = vrot.lane.b32.xlu1 %v856_v16, %s3147_s20 }
 0x82d   : > { %v859_v18 = vpop.permute.xlu1 %858 }
 0x82e   : > { %v861_v19 = vadd.f32 %v859_v18, %v851_v17 }
 0x830   : > { %2829 = vtanh.f32 %v861_v19 }
 0x83a   : > { %v2830_v20 = vpop.eup %2829 }
 0x83b   : > { %864 = vrot.lane.b32.xlu0 %v2830_v20, %s3146_s26 }
 0x8ad   : > { %v865_v21 = vpop.permute.xlu0 %864 }
 0x8ae   : > { %v3570_v22 = vmul.f32 %v2828_v12, %v865_v21 }
 0x8b0   : > { %869 = vrot.lane.b32.xlu1 %v3570_v22, %s3147_s20 }
 0x922   : > { %v870_v24 = vpop.permute.xlu1 %869 }
 0x923   : > { %872 = vst.msk [vmem:[#allocation3 + $0x2] sm:$0x1] %vm653_vm3, %v870_v24  ;;  %2547 = vmatmul.mubr.msk.f32.vlgmr.msra.gmra.mrb[4].mxu0 %vm550_vm4, %v870_v24 }
 0x924   : > { %2671 = vmatpush3.bf16.msra.mxu0 %v3496_v8  ;;  %2568 = vmatprep.mubr.msk.f32.mxu0 %vm3144_vm0, %v3145_v1 }
 0x925   : > { %2672 = vmatprep.subr.bf16.mxu0 %v3143_v0 }
 0x928   : > { %2674 = vmatpush3.bf16.msra.mxu0 %v3499_v11 }
 0x929   : > { %2681 = vmatprep.subr.bf16.mxu0 %v3143_v0 }
 0x9f6   : > { %v948_v28 = vpop.f32.mrb[4].mxu0 }
 0x9f7   : > { %v952_v29 = vadd.f32 %v948_v28, %v879_v27  ;;  %v2548_v30 = vpop.f32.mrb[5].mxu0 }
 0x9f8   : > { %v1205_v30 = vld [vmem:[#allocation2 + $0x1] sm:$0x1] }
 0x9f9   : > { %2831 = vtanh.f32 %v952_v29  ;;  %v2416_v32 = vmul.f32 -1.442695, %v952_v29  ;;  %v1204_v29 = vld [vmem:[#allocation2 + $0x6] sm:$0x1] }
 0x9fb   : > { %2833 = vpow2.f32 %v2416_v32 }
 0xa03   : > { %v2832_v31 = vpop.eup %2831 }
 0xa04   : > { %962 = vrot.lane.b32.xlu0 %v2832_v31, %s3146_s26  ;;  %v1206_v31 = vsel %vm3527_vm2, %v1204_v29, %v1205_v30  ;;  %v3150_v29 = vmov 1966171168  }
 0xa05   : > { %v2834_v33 = vpop.eup %2833  ;;  %v1514_v30 = vunpack.c.l.s4 %v3150_v29 }
 0xa06   : > { %v956_v34 = vadd.f32 1.0, %v2834_v33 }
 0xa08   : > { %2835 = vrcp.f32 %v956_v34 }
 0xa12   : > { %v2836_v35 = vpop.eup %2835 }
 0xa13   : > { %v960_v38 = vmul.f32 %v2836_v35, %v861_v19 }
 0xa76   : > { %v963_v36 = vpop.permute.xlu0 %962 }
 0xa77   : > { %v965_v37 = vmul.f32 %v2836_v35, %v963_v36 }
 0xa79   : > { %967 = vrot.lane.b32.xlu1 %v965_v37, %s3147_s20 }
 0xaeb   : > { %v968_v39 = vpop.permute.xlu1 %967 }
 0xaec   : > { %v970_v41 = vadd.f32 %v968_v39, %v960_v38 }
 0xaee   : > { %2837 = vtanh.f32 %v970_v41 }
 0xaf8   : > { %v2838_v42 = vpop.eup %2837 }
 0xaf9   : > { %973 = vrot.lane.b32.xlu0 %v2838_v42, %s3146_s26 }
 0xb6b   : > { %v974_v43 = vpop.permute.xlu0 %973 }
 0xb6c   : > { %v3587_v44 = vmul.f32 %v2836_v35, %v974_v43 }
 0xb6e   : > { %978 = vrot.lane.b32.xlu1 %v3587_v44, %s3147_s20 }
 0xbe0   : > { %v979_v45 = vpop.permute.xlu1 %978 }
 0xbe1   : > { %981 = vst.msk [vmem:[#allocation3 + $0x3] sm:$0x1] %vm653_vm3, %v979_v45  ;;  %2558 = vmatmul.mubr.msk.f32.vlgmr.msra.gmra.mrb[4].mxu1 %vm550_vm4, %v979_v45 }
 0xbe2   : > { %2677 = vmatpush3.bf16.msra.mxu1 %v3496_v8  ;;  %2579 = vmatprep.mubr.msk.f32.mxu1 %vm3144_vm0, %v3145_v1 }
 0xbe3   : > { %2678 = vmatprep.subr.bf16.mxu1 %v3143_v0 }
 0xbe6   : > { %2680 = vmatpush3.bf16.msra.mxu1 %v3499_v11 }
 0xbe7   : > { %2687 = vmatprep.subr.bf16.mxu1 %v3143_v0 }
 0xcb4   : > { %v1057_v49 = vpop.f32.mrb[4].mxu1 }
 0xcb5   : > { %v1061_v50 = vadd.f32 %v1057_v49, %v988_v48  ;;  %v2559_v51 = vpop.f32.mrb[5].mxu1 }
 0xcb6   : > { %v1313_v51 = vld [vmem:[#allocation2 + $0x7] sm:$0x1] }
 0xcb7   : > { %2839 = vtanh.f32 %v1061_v50  ;;  %v2418_v53 = vmul.f32 -1.442695, %v1061_v50 }
 0xcb9   : > { %2841 = vpow2.f32 %v2418_v53 }
 0xcc1   : > { %v2840_v52 = vpop.eup %2839 }
 0xcc2   : > { %1071 = vrot.lane.b32.xlu0 %v2840_v52, %s3146_s26  ;;  %v1314_v52 = vld [vmem:[#allocation2] sm:$0x1] }
 0xcc3   : > { %v2842_v54 = vpop.eup %2841  ;;  %v1315_v53 = vsel %vm3527_vm2, %v1313_v51, %v1314_v52 }
 0xcc4   : > { %v1065_v55 = vadd.f32 1.0, %v2842_v54 }
 0xcc6   : > { %2843 = vrcp.f32 %v1065_v55 }
 0xcd0   : > { %v2844_v56 = vpop.eup %2843 }
 0xcd1   : > { %v1069_v59 = vmul.f32 %v2844_v56, %v970_v41 }
 0xd34   : > { %v1072_v57 = vpop.permute.xlu0 %1071 }
 0xd35   : > { %v1074_v58 = vmul.f32 %v2844_v56, %v1072_v57 }
 0xd37   : > { %1076 = vrot.lane.b32.xlu1 %v1074_v58, %s3147_s20 }
 0xda9   : > { %v1077_v61 = vpop.permute.xlu1 %1076 }
 0xdaa   : > { %v1079_v62 = vadd.f32 %v1077_v61, %v1069_v59 }
 0xdac   : > { %2845 = vtanh.f32 %v1079_v62 }
 0xdb6   : > { %v2846_v63 = vpop.eup %2845 }
 0xdb7   : > { %1082 = vrot.lane.b32.xlu0 %v2846_v63, %s3146_s26 }
 0xe29   : > { %v1083_v2 = vpop.permute.xlu0 %1082 }
 0xe2a   : > { %v3604_v3 = vmul.f32 %v2844_v56, %v1083_v2 }
 0xe2c   : > { %1087 = vrot.lane.b32.xlu1 %v3604_v3, %s3147_s20 }
 0xe9e   : > { %v1088_v4 = vpop.permute.xlu1 %1087 }
 0xe9f   : > { %1090 = vst.msk [vmem:[#allocation3 + $0x4] sm:$0x1] %vm653_vm3, %v1088_v4  ;;  %2569 = vmatmul.mubr.msk.f32.vlgmr.msra.gmra.mrb[6].mxu0 %vm550_vm4, %v1088_v4 }
 0xea0   : > { %2683 = vmatpush3.bf16.msra.mxu0 %v3496_v8  ;;  %2590 = vmatprep.mubr.msk.f32.mxu0 %vm3144_vm0, %v3145_v1 }
 0xea1   : > { %2684 = vmatprep.subr.bf16.mxu0 %v3143_v0 }
 0xea4   : > { %2686 = vmatpush3.bf16.msra.mxu0 %v3499_v11 }
 0xea5   : > { %2604 = vmatprep.subr.mxu0 %v3145_v1 }
 0xf72   : > { %v1166_v9 = vpop.f32.mrb[6].mxu0 }
 0xf73   : > { %v1170_v10 = vadd.f32 %v1166_v9, %v1097_v7  ;;  %v2570_v12 = vpop.f32.mrb[7].mxu0 }
 0xf74   : > { %v1435_v12 = vld [vmem:[#allocation13 + $0x10] sm:$0xff] }
 0xf75   : > { %2847 = vtanh.f32 %v1170_v10  ;;  %v2420_v8 = vmul.f32 -1.442695, %v1170_v10  ;;  %v1434_v10 = vld [vmem:[#allocation13 + $0x8] sm:$0xff] }
 0xf77   : > { %2849 = vpow2.f32 %v2420_v8  ;;  %v1436_v8 = vld [vmem:[#allocation13 + $0x18] sm:$0xff] }
 0xf7f   : > { %v2848_v13 = vpop.eup %2847 }
 0xf80   : > { %1180 = vrot.lane.b32.xlu0 %v2848_v13, %s3146_s26 }
 0xf81   : > { %v2850_v16 = vpop.eup %2849 }
 0xf82   : > { %v1174_v17 = vadd.f32 1.0, %v2850_v16 }
 0xf84   : > { %2851 = vrcp.f32 %v1174_v17 }
 0xf8e   : > { %v2852_v11 = vpop.eup %2851 }
 0xf8f   : > { %v1178_v20 = vmul.f32 %v2852_v11, %v1079_v62 }
 0xff2   : > { %v1181_v18 = vpop.permute.xlu0 %1180 }
 0xff3   : > { %v1183_v19 = vmul.f32 %v2852_v11, %v1181_v18 }
 0xff5   : > { %1185 = vrot.lane.b32.xlu1 %v1183_v19, %s3147_s20 }
0x1067   : > { %v1186_v21 = vpop.permute.xlu1 %1185 }
0x1068   : > { %v1188_v24 = vadd.f32 %v1186_v21, %v1178_v20 }
0x106a   : > { %2853 = vtanh.f32 %v1188_v24 }
0x1074   : > { %v2854_v25 = vpop.eup %2853 }
0x1075   : > { %1191 = vrot.lane.b32.xlu0 %v2854_v25, %s3146_s26 }
0x10e7   : > { %v1192_v26 = vpop.permute.xlu0 %1191 }
0x10e8   : > { %v3621_v27 = vmul.f32 %v2852_v11, %v1192_v26  ;;  %v3664_v11 = vpack.c.bf16 %v1436_v8, %v1435_v12 }
0x10ea   : > { %1196 = vrot.lane.b32.xlu1 %v3621_v27, %s3147_s20 }
0x115c   : > { %v1197_v28 = vpop.permute.xlu1 %1196 }
0x115d   : > { %1199 = vst.msk [vmem:[#allocation3 + $0x5] sm:$0x1] %vm653_vm3, %v1197_v28  ;;  %2580 = vmatmul.mubr.msk.f32.vlgmr.msra.gmra.mrb[6].mxu1 %vm550_vm4, %v1197_v28 }
0x115e   : > { %2601 = vmatprep.mubr.msk.f32.mxu1 %vm3144_vm0, %v3145_v1 }
0x1230   : > { %v1275_v32 = vpop.f32.mrb[6].mxu1 }
0x1231   : > { %v1279_v33 = vadd.f32 %v1275_v32, %v1206_v31  ;;  %v2581_v34 = vpop.f32.mrb[7].mxu1  ;;  %v1515_v31 = vunpack.c.0.s8 %v1514_v30 }
0x1233   : > { %2855 = vtanh.f32 %v1279_v33  ;;  %v2422_v36 = vmul.f32 -1.442695, %v1279_v33  ;;  %v3689_v32 = vsub.s32 %v1515_v31, %v3519_v14 }
0x1235   : > { %2857 = vpow2.f32 %v2422_v36 }
0x123d   : > { %v2856_v35 = vpop.eup %2855 }
0x123e   : > { %1289 = vrot.lane.b32.xlu0 %v2856_v35, %s3146_s26 }
0x123f   : > { %v2858_v37 = vpop.eup %2857 }
0x1240   : > { %v1283_v38 = vadd.f32 1.0, %v2858_v37 }
0x1242   : > { %2859 = vrcp.f32 %v1283_v38 }
0x124c   : > { %v2860_v39 = vpop.eup %2859 }
0x124d   : > { %v1287_v43 = vmul.f32 %v2860_v39, %v1188_v24 }
0x12b0   : > { %v1290_v41 = vpop.permute.xlu0 %1289 }
0x12b1   : > { %v1292_v42 = vmul.f32 %v2860_v39, %v1290_v41  ;;  %v3700_v41 = vsub.s32 0, %v3519_v14 }
0x12b3   : > { %1294 = vrot.lane.b32.xlu1 %v1292_v42, %s3147_s20 }
0x1325   : > { %v1295_v45 = vpop.permute.xlu1 %1294 }
0x1326   : > { %v1297_v46 = vadd.f32 %v1295_v45, %v1287_v43 }
0x1328   : > { %2861 = vtanh.f32 %v1297_v46 }
0x1332   : > { %v2862_v47 = vpop.eup %2861 }
0x1333   : > { %1300 = vrot.lane.b32.xlu0 %v2862_v47, %s3146_s26 }
0x13a5   : > { %v1301_v48 = vpop.permute.xlu0 %1300 }
0x13a6   : > { %v1303_v49 = vmul.f32 %v2860_v39, %v1301_v48 }
0x13a8   : > { %1305 = vrot.lane.b32.xlu1 %v1303_v49, %s3147_s20 }
0x141a   : > { %v1306_v50 = vpop.permute.xlu1 %1305 }
0x141b   : > { %1308 = vst.msk [vmem:[#allocation3 + $0x6] sm:$0x1] %vm653_vm3, %v1306_v50  ;;  %2591 = vmatmul.mubr.msk.f32.vlgmr.msra.gmra.mrb[8].mxu0 %vm550_vm4, %v1306_v50 }
0x141c   : > { %2606 = vmatprep.mubr.msk.f32.mxu0 %vm3144_vm0, %v3145_v1 }
0x14ee   : > { %v1384_v54 = vpop.f32.mrb[8].mxu0 }
0x14ef   : > { %v1388_v55 = vadd.f32 %v1384_v54, %v1315_v53  ;;  %v2592_v56 = vpop.f32.mrb[9].mxu0 }
0x14f1   : > { %2863 = vtanh.f32 %v1388_v55  ;;  %v2424_v58 = vmul.f32 -1.442695, %v1388_v55 }
0x14f3   : > { %2865 = vpow2.f32 %v2424_v58  ;;  %v3712_v58 = vld [vmem:[%s3908_s6] ss:$0 sm:$0xff] }
0x14fb   : > { %v2864_v57 = vpop.eup %2863 }
0x14fc   : > { %1398 = vrot.lane.b32.xlu0 %v2864_v57, %s3146_s26 }
0x14fd   : > { %v2866_v59 = vpop.eup %2865 }
0x14fe   : > { %v1392_v61 = vadd.f32 1.0, %v2866_v59 }
0x1500   : > { %2867 = vrcp.f32 %v1392_v61 }
0x150a   : > { %v2868_v62 = vpop.eup %2867 }
0x150b   : > { %v1396_v23 = vmul.f32 %v2868_v62, %v1297_v46 }
0x156e   : > { %v1399_v63 = vpop.permute.xlu0 %1398 }
0x156f   : > { %v1401_v2 = vmul.f32 %v2868_v62, %v1399_v63 }
0x1571   : > { %1403 = vrot.lane.b32.xlu1 %v1401_v2, %s3147_s20 }
0x1575   : > { %655 = vrot.lane.b32.xlu1 %v3536_v40, %s3148_s13 }
0x1579   : > { %873 = vrot.lane.b32.xlu1 %v3570_v22, %s3148_s13 }
0x157d   : > { %1091 = vrot.lane.b32.xlu1 %v3604_v3, %s3148_s13  ;;  %v1433_v3 = vld [vmem:[#allocation13] sm:$0xff] }
0x157e   : > { %v3661_v13 = vpack.c.bf16 %v1434_v10, %v1433_v3 }
0x1580   : > { %2689 = vmatpush3.bf16.msra.mxu1 %v3661_v13 }
0x1581   : > { %1309 = vrot.lane.b32.xlu1 %v1303_v49, %s3148_s13  ;;  %2690 = vmatprep.subr.bf16.mxu1 %v3143_v0 }
0x1584   : > { %2692 = vmatpush3.bf16.msra.mxu1 %v3664_v11 }
0x1585   : > { %2620 = vmatprep.subr.mxu1 %v3145_v1 }
0x15e3   : > { %v1404_v4 = vpop.permute.xlu1 %1403 }
0x15e4   : > { %v1406_v5 = vadd.f32 %v1404_v4, %v1396_v23 }
0x15e6   : > { %2869 = vtanh.f32 %v1406_v5 }
0x15e7   : > { %v656_v6 = vpop.permute.xlu1 %655 }
0x15e8   : > { %658 = vst.msk [vmem:[#allocation4 + $0x7] sm:$0x1] %vm653_vm3, %v656_v6 }
0x15eb   : > { %v874_v7 = vpop.permute.xlu1 %873 }
0x15ec   : > { %876 = vst.msk [vmem:[#allocation4 + $0x5] sm:$0x1] %vm653_vm3, %v874_v7 }
0x15ef   : > { %v1092_v9 = vpop.permute.xlu1 %1091 }
0x15f0   : > { %v2870_v40 = vpop.eup %2869  ;;  %1094 = vst.msk [vmem:[#allocation4 + $0x3] sm:$0x1] %vm653_vm3, %v1092_v9 }
0x15f1   : > { %1409 = vrot.lane.b32.xlu0 %v2870_v40, %s3146_s26 }
0x15f3   : > { %v1310_v22 = vpop.permute.xlu1 %1309 }
0x15f4   : > { %1312 = vst.msk [vmem:[#allocation4 + $0x1] sm:$0x1] %vm653_vm3, %v1310_v22 }
0x15f5   : > { %764 = vrot.lane.b32.xlu0 %v3553_v60, %s3148_s13 }
0x15f9   : > { %982 = vrot.lane.b32.xlu0 %v3587_v44, %s3148_s13 }
0x15fd   : > { %1200 = vrot.lane.b32.xlu0 %v3621_v27, %s3148_s13 }
0x1663   : > { %v1410_v16 = vpop.permute.xlu0 %1409 }
0x1664   : > { %v1412_v17 = vmul.f32 %v2868_v62, %v1410_v16 }
0x1666   : > { %1414 = vrot.lane.b32.xlu1 %v1412_v17, %s3147_s20  ;;  %1418 = vrot.lane.b32.xlu0 %v1412_v17, %s3148_s13  ;;  %s3057_s20 = scalar_lea.vmem %s3056_s5, 256 }
0x1667   : > { %v765_v60 = vpop.permute.xlu0 %764 }
0x1668   : > { %767 = vst.msk [vmem:[#allocation4 + $0x6] sm:$0x1] %vm653_vm3, %v765_v60 }
0x166b   : > { %v983_v44 = vpop.permute.xlu0 %982 }
0x166c   : > { %985 = vst.msk [vmem:[#allocation4 + $0x4] sm:$0x1] %vm653_vm3, %v983_v44 }
0x166f   : > { %v1201_v18 = vpop.permute.xlu0 %1200 }
0x1670   : > { %1203 = vst.msk [vmem:[#allocation4 + $0x2] sm:$0x1] %vm653_vm3, %v1201_v18 }
0x16d8   : > { %v1415_v19 = vpop.permute.xlu1 %1414  ;;  %v1419_v20 = vpop.permute.xlu0 %1418 }
0x16d9   : > { %1417 = vst.msk [vmem:[#allocation3 + $0x7] sm:$0x1] %vm653_vm3, %v1415_v19  ;;  %1421 = vst.msk [vmem:[#allocation4] sm:$0x1] %vm653_vm3, %v1419_v20 }
0x16e0   : > { %v1423_v21 = vld [vmem:[#allocation4] sm:$0xff]  ;;  %v1422_v24 = vld [vmem:[#allocation3] sm:$0xff] }
0x16e1   : > { %1425 = vrot.lane.b32.xlu0 %v1423_v21, %s3148_s13 }
0x1753   : > { %v1426_v25 = vpop.permute.xlu0 %1425 }
0x1754   : > { %v3678_v26 = vsel %vm453_vm1, %v1422_v24, %v1426_v25 }
0x1755   : > { %2602 = vmatmul.mubr.msk.f32.vlgmr.msra.gmra.mrb[8].mxu1 %vm550_vm4, %v3678_v26 }
0x1756   : > { %2622 = vmatprep.mubr.msk.f32.mxu1 %vm3144_vm0, %v3145_v1 }
0x1828   : > { %v3684_v27 = vpop.f32.mrb[8].mxu1 }
0x1829   : > { %1601 = vrot.lane.b32.xlu1 %v3684_v27, %s3149_s24  ;;  %v2603_v28 = vpop.f32.mrb[9].mxu1  ;;  %v1512_v33 = vcombine.high %v3684_v27, %v3684_v27  ;;  %v1519_v34 = vrot.slane %v3684_v27, %v3689_v32 }
0x182b   : > { %v1526_v35 = vrot.slane %v1512_v33, %v3689_v32  ;;  %v1527_v36 = vcombine.high %v1519_v34, %v1519_v34  ;;  %v1535_v37 = vrot.slane %v1519_v34, %v3689_v32 }
0x182d   : > { %v1549_v38 = vrot.slane %v1527_v36, %v3689_v32  ;;  %v1542_v39 = vrot.slane %v1526_v35, %v3689_v32  ;;  %v1557_v42 = vcombine.high %v1535_v37, %v1535_v37  ;;  %v1528_v43 = vcombine.high %v1526_v35, %v1526_v35 }
0x182e   : > { %v1564_v47 = vrot.slane %v1535_v37, %v3700_v41 }
0x182f   : > { %v1559_v45 = vcombine.high %v1549_v38, %v1549_v38  ;;  %v1558_v46 = vcombine.high %v1542_v39, %v1542_v39  ;;  %v1568_v48 = vrot.slane %v1549_v38, %v3700_v41  ;;  %v1572_v49 = vrot.slane %v1557_v42, %v3700_v41 }
0x1830   : > { %v1580_v50 = vrot.slane %v1542_v39, %v3700_v41  ;;  %v1556_v14 = vrot.slane %v1528_v43, %v3689_v32 }
0x1831   : > { %v1576_v52 = vrot.slane %v1559_v45, %v3700_v41  ;;  %v1588_v53 = vrot.slane %v1558_v46, %v3700_v41 }
0x1832   : > { %v1584_v4 = vrot.slane %v1556_v14, %v3700_v41  ;;  %v1560_v5 = vcombine.high %v1556_v14, %v1556_v14 }
0x1834   : > { %v1592_v16 = vrot.slane %v1560_v5, %v3700_v41 }
0x189b   : > { %v1602_v51 = vpop.permute.xlu1 %1601 }
0x189c   : > { %v1604_v54 = vadd.f32 %v1602_v51, %v1564_v47  ;;  %v1605_v55 = vadd.f32 %v1602_v51, %v1568_v48  ;;  %v1606_v56 = vadd.f32 %v1602_v51, %v1572_v49  ;;  %v1608_v57 = vadd.f32 %v1602_v51, %v1580_v50 }
0x189d   : > { %v1607_v59 = vadd.f32 %v1602_v51, %v1576_v52  ;;  %v1610_v61 = vadd.f32 %v1602_v51, %v1588_v53  ;;  %v1609_v22 = vadd.f32 %v1602_v51, %v1584_v4  ;;  %v1611_v60 = vadd.f32 %v1602_v51, %v1592_v16  ;;  %v3744_v53 = vld [vmem:[%s387_s18] sm:$0xff]  ;;  %s3948_s18 = sld [smem:[#allocation28_spill]] }
0x189e   : > { %v1612_v62 = vmax.f32 %v1604_v54, 0.0  ;;  %v1613_v63 = vmax.f32 %v1605_v55, 0.0  ;;  %v1614_v2 = vmax.f32 %v1606_v56, 0.0  ;;  %v1616_v23 = vmax.f32 %v1608_v57, 0.0 }
0x189f   : > { %v1615_v9 = vmax.f32 %v1607_v59, 0.0  ;;  %v1618_v40 = vmax.f32 %v1610_v61, 0.0  ;;  %v1617_v17 = vmax.f32 %v1609_v22, 0.0  ;;  %v1619_v28 = vmax.f32 %v1611_v60, 0.0 }
0x18a0   : > { %v1626_v6 = vmul.f32 %v3712_v58, %v1612_v62  ;;  %v1627_v7 = vmul.f32 %v3712_v58, %v1613_v63  ;;  %v1628_v12 = vmul.f32 %v3712_v58, %v1614_v2  ;;  %v1630_v8 = vmul.f32 %v3712_v58, %v1616_v23 }
0x18a1   : > { %v1629_v19 = vmul.f32 %v3712_v58, %v1615_v9  ;;  %v1632_v20 = vmul.f32 %v3712_v58, %v1618_v40  ;;  %v1631_v25 = vmul.f32 %v3712_v58, %v1617_v17  ;;  %v1633_v30 = vmul.f32 %v3712_v58, %v1619_v28 }
0x18a2   : > { %v1634_v3 = vsel %vm550_vm4, %v1626_v6, 0.0  ;;  %v1637_v10 = vsel %vm550_vm4, %v1627_v7, 0.0  ;;  %v1640_v44 = vsel %vm550_vm4, %v1628_v12, 0.0  ;;  %v1646_v18 = vsel %vm550_vm4, %v1630_v8, 0.0 }
0x18a3   : > { %1635 = vadd.xlane.f32.xlu0 %v1634_v3  ;;  %1638 = vadd.xlane.f32.xlu1 %v1637_v10  ;;  %v1643_v21 = vsel %vm550_vm4, %v1629_v19, 0.0  ;;  %v1652_v24 = vsel %vm550_vm4, %v1632_v20, 0.0  ;;  %v1649_v29 = vsel %vm550_vm4, %v1631_v25, 0.0  ;;  %v1655_v31 = vsel %vm550_vm4, %v1633_v30, 0.0  ;;  %s3857_s17 = scalar_lea.hbm %s3948_s18, %s2433_s19 }
0x18a4   : > { %vm1430_vm12 = vcmp.ne.f32.partialorder %v3744_v53, 0.0  ;;  %vm1431_vm14 = vcmp.gt.f32.partialorder %v3744_v53, 0.0 }
0x18a5   : > { %vm3762_vm15 = vmand %vm1430_vm12, %vm1431_vm14 }
0x18a7   : > { %1641 = vadd.xlane.f32.xlu0 %v1640_v44  ;;  %1647 = vadd.xlane.f32.xlu1 %v1646_v18 }
0x18ab   : > { %1644 = vadd.xlane.f32.xlu0 %v1643_v21  ;;  %1653 = vadd.xlane.f32.xlu1 %v1652_v24 }
0x18af   : > { %1650 = vadd.xlane.f32.xlu0 %v1649_v29 }
0x18b3   : > { %1656 = vadd.xlane.f32.xlu0 %v1655_v31 }
0x1930   : > { %v1636_v33 = vpop.xlane.xlu0 %1635  ;;  %v1639_v34 = vpop.xlane.xlu1 %1638 }
0x1931   : > { %v1669_v36 = vrot.slane %v1636_v33, %v3522_v15  ;;  %v1673_v37 = vrot.slane %v1639_v34, %v3522_v15 }
0x1933   : > { %v1699_v43 = vsel %vm1698_vm5, %v1673_v37, %v1669_v36 }
0x1934   : > { %v1642_v35 = vpop.xlane.xlu0 %1641  ;;  %v1648_v39 = vpop.xlane.xlu1 %1647 }
0x1935   : > { %v1677_v38 = vrot.slane %v1642_v35, %v3522_v15  ;;  %v1685_v48 = vrot.slane %v1648_v39, %v3522_v15 }
0x1937   : > { %v1701_v46 = vsel %vm1700_vm6, %v1677_v38, %v1699_v43 }
0x1938   : > { %v1645_v42 = vpop.xlane.xlu0 %1644  ;;  %v1654_v50 = vpop.xlane.xlu1 %1653 }
0x1939   : > { %v1681_v45 = vrot.slane %v1645_v42, %v3522_v15  ;;  %v1693_v54 = vrot.slane %v1654_v50, %v3522_v15 }
0x193b   : > { %v1703_v47 = vsel %vm1702_vm7, %v1681_v45, %v1701_v46 }
0x193c   : > { %v1651_v49 = vpop.xlane.xlu0 %1650  ;;  %v1705_v52 = vsel %vm1704_vm8, %v1685_v48, %v1703_v47 }
0x193d   : > { %v1689_v51 = vrot.slane %v1651_v49, %v3522_v15 }
0x193f   : > { %v1707_v14 = vsel %vm1706_vm9, %v1689_v51, %v1705_v52 }
0x1940   : > { %v1657_v55 = vpop.xlane.xlu0 %1656  ;;  %v1709_v57 = vsel %vm1708_vm10, %v1693_v54, %v1707_v14 }
0x1941   : > { %v1697_v56 = vrot.slane %v1657_v55, %v3522_v15 }
0x1943   : > { %v1711_v59 = vsel %vm1710_vm11, %v1697_v56, %v1709_v57 }
0x1944   : > { %v1713_v61 = vsel %vm1430_vm12, %v1711_v59, -100.0 }
0x1945   : > { %v1715_v62 = vsel %vm1714_vm13, %v1713_v61, -inf }
0x1946   : > { %1716 = vmax.xlane.f32.xlu1 %v1715_v62 }
0x1957   : > { %1727 = vrot.lane.b32.xlu1 %v3684_v27, %s3146_s26 }
0x19d3   : > { %v1717_v63 = vpop.xlane.xlu1 %1716 }
0x19d4   : > { %v1718_v2 = vsub.f32 %v1713_v61, %v1717_v63 }
0x19d6   : > { %v1719_v23 = vmul.f32 1.442695, %v1718_v2 }
0x19d7   : > { %v1728_v4 = vpop.permute.xlu1 %1727 }
0x19d8   : > { %2871 = vpow2.f32 %v1719_v23  ;;  %2605 = vmatpush3.msra.mxu0 %v1728_v4 }
0x19d9   : > { %2693 = vmatprep.subr.bf16.mxu0 %v3143_v0 }
0x19e2   : > { %v2872_v5 = vpop.eup %2871 }
0x19e3   : > { %v1721_v6 = vsel %vm1714_vm13, %v2872_v5, 0.0 }
0x19e4   : > { %1722 = vadd.xlane.f32.xlu0 %v1721_v6 }
0x1a71   : > { %v1723_v7 = vpop.xlane.xlu0 %1722 }
0x1a72   : > { %2873 = vrcp.f32 %v1723_v7 }
0x1a7c   : > { %v2874_v9 = vpop.eup %2873 }
0x1a7d   : > { %v1725_v40 = vmul.f32 %v2874_v9, %v2872_v5 }
0x1a7f   : > { %v1726_v22 = vsel %vm3762_vm15, %v1725_v40, 0.0 }
0x1a80   : > { %2607 = vmatmul.mubr.msk.f32.vlgmr.msra.gmra.mrb[10].mxu0 %vm1714_vm13, %v1726_v22 }
0x1a81   : > { %2695 = vmatpush3.bf16.msra.mxu0 %v3661_v13  ;;  %2617 = vmatprep.mubr.msk.f32.mxu0 %vm3144_vm0, %v3145_v1 }
0x1a82   : > { %2696 = vmatprep.subr.bf16.mxu0 %v3143_v0 }
0x1a85   : > { %2698 = vmatpush3.bf16.msra.mxu0 %v3664_v11 }
0x1b53   : > { %v1799_v3 = vpop.f32.mrb[10].mxu0 }
0x1b54   : > { %v3775_v10 = vadd.f32 %v1799_v3, %v3678_v26  ;;  %v2608_v12 = vpop.f32.mrb[11].mxu0 }
0x1b56   : > { %v1804_v8 = vmax.f32 %v3775_v10, 0.0 }
0x1b58   : > { %2618 = vmatmul.mubr.msk.f32.vlgmr.msra.gmra.mrb[12].mxu0 %vm550_vm4, %v1804_v8 }
0x1c2b   : > { %v3781_v16 = vpop.f32.mrb[12].mxu0 }
0x1c2c   : > { %1968 = vrot.lane.b32.xlu0 %v3781_v16, %s3149_s24  ;;  %v2619_v13 = vpop.f32.mrb[13].mxu0  ;;  %v1886_v11 = vrot.slane %v3781_v16, %v3689_v32  ;;  %v1879_v26 = vcombine.high %v3781_v16, %v3781_v16 }
0x1c2e   : > { %v1894_v17 = vcombine.high %v1886_v11, %v1886_v11  ;;  %v1893_v60 = vrot.slane %v1879_v26, %v3689_v32  ;;  %v1902_v44 = vrot.slane %v1886_v11, %v3689_v32 }
0x1c30   : > { %v1916_v18 = vrot.slane %v1894_v17, %v3689_v32  ;;  %v1895_v19 = vcombine.high %v1893_v60, %v1893_v60  ;;  %v1924_v20 = vcombine.high %v1902_v44, %v1902_v44  ;;  %v1909_v24 = vrot.slane %v1893_v60, %v3689_v32 }
0x1c31   : > { %v1931_v28 = vrot.slane %v1902_v44, %v3700_v41 }
0x1c32   : > { %v1926_v21 = vcombine.high %v1916_v18, %v1916_v18  ;;  %v1923_v25 = vrot.slane %v1895_v19, %v3689_v32  ;;  %v1935_v29 = vrot.slane %v1916_v18, %v3700_v41  ;;  %v1939_v30 = vrot.slane %v1924_v20, %v3700_v41 }
0x1c33   : > { %v1947_v34 = vrot.slane %v1909_v24, %v3700_v41  ;;  %v1925_v36 = vcombine.high %v1909_v24, %v1909_v24 }
0x1c34   : > { %v1943_v31 = vrot.slane %v1926_v21, %v3700_v41  ;;  %v1951_v35 = vrot.slane %v1923_v25, %v3700_v41  ;;  %v1927_v37 = vcombine.high %v1923_v25, %v1923_v25 }
0x1c35   : > { %v1955_v50 = vrot.slane %v1925_v36, %v3700_v41 }
0x1c36   : > { %v1959_v51 = vrot.slane %v1927_v37, %v3700_v41 }
0x1c9e   : > { %v1969_v33 = vpop.permute.xlu0 %1968 }
0x1c9f   : > { %v1971_v38 = vadd.f32 %v1969_v33, %v1931_v28  ;;  %v1972_v39 = vadd.f32 %v1969_v33, %v1935_v29  ;;  %v1973_v42 = vadd.f32 %v1969_v33, %v1939_v30  ;;  %v1974_v43 = vadd.f32 %v1969_v33, %v1943_v31 }
0x1ca0   : > { %v1975_v32 = vadd.f32 %v1969_v33, %v1947_v34  ;;  %v1976_v45 = vadd.f32 %v1969_v33, %v1951_v35  ;;  %v1977_v56 = vadd.f32 %v1969_v33, %v1955_v50  ;;  %v1978_v57 = vadd.f32 %v1969_v33, %v1959_v51 }
0x1ca1   : > { %v1979_v46 = vmax.f32 %v1971_v38, 0.0  ;;  %v1980_v47 = vmax.f32 %v1972_v39, 0.0  ;;  %v1981_v48 = vmax.f32 %v1973_v42, 0.0  ;;  %v1982_v49 = vmax.f32 %v1974_v43, 0.0 }
0x1ca2   : > { %v1983_v54 = vmax.f32 %v1975_v32, 0.0  ;;  %v1984_v55 = vmax.f32 %v1976_v45, 0.0  ;;  %v1985_v2 = vmax.f32 %v1977_v56, 0.0  ;;  %v1986_v41 = vmax.f32 %v1978_v57, 0.0 }
0x1ca3   : > { %v1987_v52 = vmul.f32 %v3712_v58, %v1979_v46  ;;  %v1988_v14 = vmul.f32 %v3712_v58, %v1980_v47  ;;  %v1989_v62 = vmul.f32 %v3712_v58, %v1981_v48  ;;  %v1990_v63 = vmul.f32 %v3712_v58, %v1982_v49  ;;  %v2158_v48 = vld [vmem:[#allocation14] sm:$0xff]  ;;  %v2159_v49 = vld [vmem:[#allocation14 + $0x8] sm:$0xff] }
0x1ca4   : > { %v1991_v5 = vmul.f32 %v3712_v58, %v1983_v54  ;;  %v1992_v6 = vmul.f32 %v3712_v58, %v1984_v55  ;;  %v1993_v40 = vmul.f32 %v3712_v58, %v1985_v2  ;;  %v1994_v22 = vmul.f32 %v3712_v58, %v1986_v41  ;;  %v2161_v54 = vld [vmem:[#allocation14 + $0x18] sm:$0xff] }
0x1ca5   : > { %v1995_v59 = vsel %vm550_vm4, %v1987_v52, 0.0  ;;  %v1998_v61 = vsel %vm550_vm4, %v1988_v14, 0.0  ;;  %v2001_v23 = vsel %vm550_vm4, %v1989_v62, 0.0  ;;  %v2004_v4 = vsel %vm550_vm4, %v1990_v63, 0.0  ;;  %v2160_v14 = vld [vmem:[#allocation14 + $0x10] sm:$0xff] }
0x1ca6   : > { %1996 = vadd.xlane.f32.xlu1 %v1995_v59  ;;  %1999 = vadd.xlane.f32.xlu0 %v1998_v61  ;;  %v2007_v7 = vsel %vm550_vm4, %v1991_v5, 0.0  ;;  %v2010_v9 = vsel %vm550_vm4, %v1992_v6, 0.0  ;;  %v2013_v3 = vsel %vm550_vm4, %v1993_v40, 0.0  ;;  %v2016_v12 = vsel %vm550_vm4, %v1994_v22, 0.0 }
0x1ca7   : > { %v2700_v52 = vpack.c.bf16 %v2159_v49, %v2158_v48  ;;  %v2703_v55 = vpack.c.bf16 %v2161_v54, %v2160_v14 }
0x1caa   : > { %2002 = vadd.xlane.f32.xlu1 %v2001_v23  ;;  %2005 = vadd.xlane.f32.xlu0 %v2004_v4 }
0x1cae   : > { %2008 = vadd.xlane.f32.xlu1 %v2007_v7  ;;  %2011 = vadd.xlane.f32.xlu0 %v2010_v9 }
0x1cb2   : > { %2014 = vadd.xlane.f32.xlu1 %v2013_v3  ;;  %2017 = vadd.xlane.f32.xlu0 %v2016_v12 }
0x1d33   : > { %v1997_v13 = vpop.xlane.xlu1 %1996  ;;  %v2000_v11 = vpop.xlane.xlu0 %1999 }
0x1d34   : > { %v2030_v26 = vrot.slane %v1997_v13, %v3522_v15  ;;  %v2034_v17 = vrot.slane %v2000_v11, %v3522_v15 }
0x1d36   : > { %v2059_v58 = vsel %vm1698_vm5, %v2034_v17, %v2030_v26 }
0x1d37   : > { %v2003_v60 = vpop.xlane.xlu1 %2002  ;;  %v2006_v44 = vpop.xlane.xlu0 %2005 }
0x1d38   : > { %v2038_v18 = vrot.slane %v2003_v60, %v3522_v15  ;;  %v2042_v19 = vrot.slane %v2006_v44, %v3522_v15 }
0x1d3a   : > { %v2060_v20 = vsel %vm1700_vm6, %v2038_v18, %v2059_v58 }
0x1d3b   : > { %v2009_v21 = vpop.xlane.xlu1 %2008  ;;  %v2012_v24 = vpop.xlane.xlu0 %2011  ;;  %v2061_v28 = vsel %vm1702_vm7, %v2042_v19, %v2060_v20 }
0x1d3c   : > { %v2046_v25 = vrot.slane %v2009_v21, %v3522_v15  ;;  %v2050_v29 = vrot.slane %v2012_v24, %v3522_v15 }
0x1d3e   : > { %v2062_v30 = vsel %vm1704_vm8, %v2046_v25, %v2061_v28 }
0x1d3f   : > { %v2015_v31 = vpop.xlane.xlu1 %2014  ;;  %v2018_v33 = vpop.xlane.xlu0 %2017  ;;  %v2063_v36 = vsel %vm1706_vm9, %v2050_v29, %v2062_v30 }
0x1d40   : > { %v2054_v34 = vrot.slane %v2015_v31, %v3522_v15  ;;  %v2058_v35 = vrot.slane %v2018_v33, %v3522_v15 }
0x1d42   : > { %v2064_v37 = vsel %vm1708_vm10, %v2054_v34, %v2063_v36 }
0x1d43   : > { %v2065_v38 = vsel %vm1710_vm11, %v2058_v35, %v2064_v37 }
0x1d44   : > { %v2067_v39 = vsel %vm1430_vm12, %v2065_v38, -100.0 }
0x1d45   : > { %v2068_v42 = vsel %vm1714_vm13, %v2067_v39, -inf }
0x1d46   : > { %2069 = vmax.xlane.f32.xlu1 %v2068_v42 }
0x1d57   : > { %2080 = vrot.lane.b32.xlu1 %v3781_v16, %s3146_s26  ;;  %s3051_s26 = scalar_lea.vmem %s3859_s2, 128 }
0x1d58   : > { %p3052_p0 = scmp.ne.s32.totalorder %s3859_s2, %s3051_s26  ;;  %p3059_p7 = scmp.lt.s32.totalorder %s3057_s20, %s3051_s26 }
0x1d5a   : > { %p3053_p4 = pnand %p3052_p0, %p3949_p2  ;;  %p3060_p8 = por %p3059_p7, %p3058_p5 }
0x1d5c   : > { %p3054_p10 = pneg %p3053_p4 }
0x1d5e   : > { %p3061_p6 = pnand %p3060_p8, %p3054_p10 }
0x1dd3   : > { %v2070_v43 = vpop.xlane.xlu1 %2069 }
0x1dd4   : > { %v2071_v32 = vsub.f32 %v2067_v39, %v2070_v43 }
0x1dd6   : > { %v2072_v45 = vmul.f32 1.442695, %v2071_v32 }
0x1dd7   : > { %v2081_v46 = vpop.permute.xlu1 %2080 }
0x1dd8   : > { %2875 = vpow2.f32 %v2072_v45  ;;  %2621 = vmatpush3.msra.mxu1 %v2081_v46 }
0x1dd9   : > { %2699 = vmatprep.subr.bf16.mxu1 %v3143_v0 }
0x1de2   : > { %v2876_v15 = vpop.eup %2875 }
0x1de3   : > { %v2074_v47 = vsel %vm1714_vm13, %v2876_v15, 0.0 }
0x1de4   : > { %2075 = vadd.xlane.f32.xlu0 %v2074_v47 }
0x1e71   : > { %v2076_v53 = vpop.xlane.xlu0 %2075 }
0x1e72   : > { %2877 = vrcp.f32 %v2076_v53 }
0x1e7c   : > { %v2878_v50 = vpop.eup %2877 }
0x1e7d   : > { %v2078_v51 = vmul.f32 %v2878_v50, %v2876_v15 }
0x1e7f   : > { %v2079_v16 = vsel %vm3762_vm15, %v2078_v51, 0.0 }
0x1e80   : > { %2623 = vmatmul.mubr.msk.f32.vlgmr.msra.gmra.mrb[10].mxu1 %vm1714_vm13, %v2079_v16 }
0x1e81   : > { %2701 = vmatpush3.bf16.msra.mxu1 %v2700_v52  ;;  %2633 = vmatprep.mubr.msk.f32.mxu1 %vm3144_vm0, %v3145_v1  ;;  %v2430_v1 = vld [vmem:[%s3910_s8] ss:$0 sm:$0xff] }
0x1e82   : > { %2702 = vmatprep.subr.bf16.mxu1 %v3143_v0 }
0x1e85   : > { %2704 = vmatpush3.bf16.msra.mxu1 %v2703_v55 }
0x1f53   : > { %v2152_v56 = vpop.f32.mrb[10].mxu1 }
0x1f54   : > { %v2156_v27 = vadd.f32 %v2152_v56, %v1804_v8  ;;  %v2624_v57 = vpop.f32.mrb[11].mxu1 }
0x1f56   : > { %v2157_v59 = vmax.f32 %v2156_v27, 0.0 }
0x1f58   : > { %2634 = vmatmul.mubr.msk.f32.vlgmr.msra.gmra.mrb[12].mxu1 %vm550_vm4, %v2157_v59 }
0x202b   : > { %v2238_v61 = vpop.f32.mrb[12].mxu1 }
0x202c   : > { %v2239_v0 = vadd.f32 %v2430_v1, %v2238_v61  ;;  %v2635_v62 = vpop.f32.mrb[13].mxu1 }
0x202e   : > { %v2242_v63 = vmax.f32 %v2239_v0, 0.0 }
0x2030   : > { %2243 = vst.msk [vmem:[%s442_s9] sm:$0xff] %vm550_vm4, %v2242_v63 }
0x2031   : > { %3064 = shalt.err (!%p3061_p6)
}
0x2032   : > { %s3065_s21 = scalar_lea.hbm %s3857_s17, 128  ;;  %s3069_s25 = scalar_lea.hbm %s3948_s18, 256 }
0x2033   : > { %p3066_p11 = scmp.ne.s32.totalorder %s3857_s17, %s3065_s21  ;;  %p3070_p12 = scmp.lt.u32.totalorder %s3857_s17, %s3948_s18 }
0x2034   : > { %p3071_p3 = scmp.lt.u32.totalorder %s3069_s25, %s3065_s21  ;;  %p3073_p0 = scmp.lt.u32.totalorder %s3065_s21, %s3857_s17 }
0x2035   : > { %p3067_p1 = pnand %p3066_p11, %p3949_p2 }
0x2036   : > { %p3072_p13 = por %p3071_p3, %p3070_p12 }
0x2037   : > { %p3068_p9 = pneg %p3067_p1 }
0x2038   : > { %p3074_p4 = por %p3073_p0, %p3072_p13 }
0x203a   : > { %p3075_p10 = pnand %p3074_p4, %p3068_p9 }
0x203c   : > { %3078 = shalt.err (!%p3075_p10)
}
0x203d   : > { %2725 = dma.vmem_to_hbm [thread:$0]  (%p3949_p2), %s3859_s2, 128, %s3857_s17, %s2245_s7  }
0x203e PF: > { %s2270_s14 = sand.u32 1, %s3121_s30   ;;  %p3950_p5 = scmp.ne.s32.totalorder %s3934_s28, 0 }
0x203f   : > { %p3951_p7 = scmp.ge.s32.totalorder %s3133_s12, 2  ;;  %s2271_s19 = scalar_lea.sflag [#allocation7], %s2270_s14 }
0x2041   : > { %p2748_p8 = pnand %p3951_p7, %p3950_p5 }
0x2043   : > { %3116 = dma.done.wait (!%p2748_p8), %s2271_s19, 128  }
0x2044   : > { %3118 = vsyncadd (!%p2748_p8), %s2271_s19, 4294967168  ;;  %s3952_s9 = sld [smem:[#allocation23_spill]]  ;;  %p27_p6 = scmp.ge.s32.totalorder %s3354_s27, 4  }
0x2045   : > { %s3953_s30 = smov %s3125_s10  ;;  %s3954_s10 = smov %s3129_s11 }
0x2046   : > { %s3956_s12 = smov %s3354_s27  ;;  %29 = sbr.rel (!%p27_p6) target bundleno = 15 (0xf), region = 130 }
0x204a   : > { %s3955_s11 = smov %s3952_s9 }
0x204d   :  { %2276 = vsyncpa [#allocation6], 1 }
0x204e   :  { %2278 = vsyncpa [#allocation6 + $0x1], 1 }
0x204f   :  { %2279 = vsyncpa [#allocation9], 1 }
0x2050   :  { %2281 = vsyncpa [#allocation9 + $0x1], 1 }
0x2051   :  { %2282 = vsyncpa [#allocation12], 1 }
0x2052   :  { %2283 = vsyncpa [#allocation15], 1 }
0x2053   :  { %2284 = vsyncpa [#allocation7], 1 }
0x2054   :  { %2286 = vsyncpa [#allocation7 + $0x1], 1 }

</bundles_post_ra>
